<compile_context>
chip_gen: v6e
topology: v6e:2x2x1
jax: 0.10.0
libtpu: 0.0.40
codegen_flags: <defaults>
</compile_context>

<pallas_src>
import functools

import jax
import jax.numpy as jnp
from jax.experimental import pallas as pl
from jax.experimental.pallas import tpu as pltpu

LANE = 128
VMEM_CAP_BYTES = 48 * 1024 * 1024   # conservative cap: safe on v7x (64 MiB/TC physical)


def _round_up(n, m):
    return -(-n // m) * m


def _pad2d(a, rows, cols):
    return jnp.pad(a, ((0, rows - a.shape[0]), (0, cols - a.shape[1])))


def _make_vae_kernel(n_enc, n_dec, z_dim_p, compute_dtype):
    """Fused kernel: n_enc encoder layers, fused heads, reparam, n_dec decoder layers."""

    def kernel(*refs):
        # ref order:
        #   x_tile, eps_tile,
        #   (W, b) * n_enc,               W already [in_p, out_p]
        #   W_heads, b_heads,             [enc_last_p, 2*z_dim_p]
        #   (W, b) * n_dec,
        #   out_x_tile, out_lat_tile
        idx = 0
        x = refs[idx][...]; idx += 1
        eps = refs[idx][...]; idx += 1

        def matmul(a, w_ref, b_ref):
            # Pre-transposed weights: y = a @ W + b (MXU-natural [K, N] operand).
            # bf16 operands (default), f32 accumulation, f32 bias.
            a = a.astype(compute_dtype)
            return jnp.dot(a, w_ref[...], preferred_element_type=jnp.float32) + b_ref[...]

        # --- encoder: Linear + ReLU (ReLU also on last encoder layer) ---
        h = x
        for _ in range(n_enc):
            h = jnp.maximum(matmul(h, refs[idx], refs[idx + 1]), 0.0)
            idx += 2

        # --- fused mean / log_var head: one wide matmul, lane-aligned split ---
        heads = matmul(h, refs[idx], refs[idx + 1]); idx += 2   # [TB, 2*Zp]
        mean = heads[:, :z_dim_p]
        log_var = heads[:, z_dim_p:]

        # --- reparametrize: z = mean + eps * exp(log_var / 2)  (all f32) ---
        z = mean + eps * jnp.exp(log_var * 0.5)

        out_x_ref = refs[-2]
        out_lat_ref = refs[-1]
        # Store the latent slab NOW with two lane-aligned (128-multiple offset)
        # slice stores -> no concat temporary, mean/log_var/z die before the
        # decoder matmuls.
        out_lat_ref[:, : 2 * z_dim_p] = heads
        out_lat_ref[:, 2 * z_dim_p:] = z

        # --- decoder: Linear + ReLU, last layer Sigmoid ---
        d = z
        for li in range(n_dec):
            d = matmul(d, refs[idx], refs[idx + 1]); idx += 2
            d = jnp.maximum(d, 0.0) if li < n_dec - 1 else jax.nn.sigmoid(d)

        out_x_ref[...] = d

    return kernel


def init_vae_params(key, x_dim, z_dim, encoder_h_dim, decoder_h_dim):
    """Deterministic PyTorch-style (uniform +/- 1/sqrt(fan_in)) Linear init."""
    def linear_init(k, out_f, in_f):
        kw, kb = jax.random.split(k)
        bound = 1.0 / jnp.sqrt(in_f)
        w = jax.random.uniform(kw, (out_f, in_f), jnp.float32, -bound, bound)
        b = jax.random.uniform(kb, (1, out_f), jnp.float32, -bound, bound)
        return w, b

    params = {"enc": [], "dec": []}
    enc_dims = [x_dim] + list(encoder_h_dim)
    dec_dims = [z_dim] + list(decoder_h_dim) + [x_dim]

    keys = jax.random.split(key, len(enc_dims) - 1 + len(dec_dims) - 1 + 2)
    ki = 0
    for i in range(len(enc_dims) - 1):
        params["enc"].append(linear_init(keys[ki], enc_dims[i + 1], enc_dims[i])); ki += 1
    params["mean"] = linear_init(keys[ki], z_dim, encoder_h_dim[-1]); ki += 1
    params["logvar"] = linear_init(keys[ki], z_dim, encoder_h_dim[-1]); ki += 1
    for i in range(len(dec_dims) - 1):
        params["dec"].append(linear_init(keys[ki], dec_dims[i + 1], dec_dims[i])); ki += 1
    return params


@functools.partial(
    jax.jit,
    static_argnames=("x_dim", "z_dim", "compute_dtype", "single_buffer_weights"),
)
def vae_forward(x, eps, params, *, x_dim, z_dim,
                compute_dtype=jnp.bfloat16, single_buffer_weights=True):
    B = x.shape[0]
    n_enc = len(params["enc"])
    n_dec = len(params["dec"])

    x_dim_p = _round_up(x_dim, LANE)
    z_dim_p = _round_up(z_dim, LANE)

    # --- batch tile: fill the MXU M dim; keep >=2 grid steps before going to
    #     TB=256 so the 'parallel' axis can still shard across v7x's 2 TCs. ---
    B8 = _round_up(B, 8)
    if B8 >= 512:
        TB = 256
    elif B8 >= 128:
        TB = 128
    else:
        TB = B8
    B_pad = _round_up(B, TB)
    grid = (B_pad // TB,)

    # --- wrapper-side layout work: transpose to [in, out], zero-pad, cast ---
    def pack_linear(w, b, in_p, out_p):
        wt = _pad2d(w.T, in_p, out_p).astype(compute_dtype)   # [in_p, out_p]
        bp = _pad2d(b, 1, out_p).astype(jnp.float32)          # [1, out_p]
        return wt, bp

    flat = []
    flat.append(_pad2d(x.astype(jnp.float32), B_pad, x_dim_p))       # x
    flat.append(_pad2d(eps.astype(jnp.float32), B_pad, z_dim_p))     # eps

    prev_p = x_dim_p
    for w, b in params["enc"]:
        out_p = _round_up(w.shape[0], LANE)
        flat.extend(pack_linear(w, b, prev_p, out_p))
        prev_p = out_p
    enc_last_p = prev_p

    # fused mean/log_var head: [enc_last_p, 2*z_dim_p]
    wm, bm = params["mean"]
    wlv, blv = params["logvar"]
    w_heads = jnp.concatenate(
        [_pad2d(wm.T, enc_last_p, z_dim_p), _pad2d(wlv.T, enc_last_p, z_dim_p)],
        axis=1).astype(compute_dtype)
    b_heads = jnp.concatenate(
        [_pad2d(bm, 1, z_dim_p), _pad2d(blv, 1, z_dim_p)], axis=1).astype(jnp.float32)
    flat.extend([w_heads, b_heads])

    prev_p = z_dim_p
    for w, b in params["dec"]:
        out_p = _round_up(w.shape[0], LANE)
        flat.extend(pack_linear(w, b, prev_p, out_p))
        prev_p = out_p
    # prev_p == x_dim_p (decoder ends at x_dim)

    # --- specs: pipeline batch tiles, keep params resident across grid ---
    def tile_spec(cols):
        return pl.BlockSpec((TB, cols), lambda i: (i, 0))

    def resident_spec(arr):
        r, c = arr.shape
        if single_buffer_weights:
            # Constant index_map -> one buffer is enough; halves weight VMEM.
            return pl.BlockSpec((r, c), lambda i: (0, 0),
                                pipeline_mode=pl.Buffered(1))
        return pl.BlockSpec((r, c), lambda i: (0, 0))

    in_specs = [tile_spec(x_dim_p), tile_spec(z_dim_p)] + \
               [resident_spec(a) for a in flat[2:]]
    out_specs = (tile_spec(x_dim_p), tile_spec(3 * z_dim_p))
    out_shapes = (
        jax.ShapeDtypeStruct((B_pad, x_dim_p), jnp.float32),      # reconstructed x (padded)
        jax.ShapeDtypeStruct((B_pad, 3 * z_dim_p), jnp.float32),  # packed mean|log_var|z
    )

    # --- VMEM budget: actual requirement (resident weights x buffer count +
    #     double-buffered x/eps/out tiles) with headroom, capped for v7x. ---
    wbuf = 1 if single_buffer_weights else 2
    weight_bytes = sum(int(a.size) * a.dtype.itemsize for a in flat[2:]) * wbuf
    tile_bytes = 2 * 4 * TB * (x_dim_p + z_dim_p + x_dim_p + 3 * z_dim_p)
    required = weight_bytes + tile_bytes
    vmem_limit = int(min(max(required * 1.5, 32 * 1024 * 1024), VMEM_CAP_BYTES))
    # TODO(synk): if `required` ever exceeds VMEM_CAP_BYTES (very large hidden
    # dims on v7x), switch the weight inputs to a per-layer streaming pipeline
    # (pltpu.emit_pipeline) instead of resident full-array blocks.

    kernel = _make_vae_kernel(n_enc, n_dec, z_dim_p, compute_dtype)

    out_x_p, out_lat_p = pl.pallas_call(
        kernel,
        out_shape=out_shapes,
        grid=grid,
        in_specs=in_specs,
        out_specs=out_specs,
        compiler_params=pltpu.CompilerParams(
            dimension_semantics=("parallel",),   # megacore batch sharding on v7x
            vmem_limit_bytes=vmem_limit,
        ),
    )(*flat)

    # slice padded outputs back to the true module shapes
    x_rec = out_x_p[:B, :x_dim]
    mean = out_lat_p[:B, 0:z_dim]
    log_var = out_lat_p[:B, z_dim_p:z_dim_p + z_dim]
    z = out_lat_p[:B, 2 * z_dim_p:2 * z_dim_p + z_dim]
    return x_rec, mean, log_var, z


def run_vae(x, eps, params, *, x_dim, z_dim, compute_dtype):
    """Call the kernel, preferring single-buffered resident weights; fall back
    to default double-buffering if this jax build rejects pipeline_mode."""
    try:
        out = vae_forward(x, eps, params, x_dim=x_dim, z_dim=z_dim,
                          compute_dtype=compute_dtype, single_buffer_weights=True)
        jax.block_until_ready(out)
        return out
    except Exception:
        out = vae_forward(x, eps, params, x_dim=x_dim, z_dim=z_dim,
                          compute_dtype=compute_dtype, single_buffer_weights=False)
        jax.block_until_ready(out)
        return out


def vae_forward_ref(x, eps, params):
    """Pure-JAX reference for numerical check."""
    h = x
    for w, b in params["enc"]:
        h = jnp.maximum(h @ w.T + b, 0.0)
    mean = h @ params["mean"][0].T + params["mean"][1]
    log_var = h @ params["logvar"][0].T + params["logvar"][1]
    z = mean + eps * jnp.exp(log_var * 0.5)
    d = z
    for i, (w, b) in enumerate(params["dec"]):
        d = d @ w.T + b
        d = jnp.maximum(d, 0.0) if i < len(params["dec"]) - 1 else jax.nn.sigmoid(d)
    return d, mean, log_var, z


if __name__ == "__main__":
    # Small shapes consistent with the module's forward.
    B = 8
    x_dim = 16
    z_dim = 8
    encoder_h_dim = [32, 32]
    decoder_h_dim = [32, 32]

    root = jax.random.PRNGKey(0)
    k_params, k_x, k_eps = jax.random.split(root, 3)

    params = init_vae_params(k_params, x_dim, z_dim, encoder_h_dim, decoder_h_dim)
    x = jax.random.normal(k_x, (B, x_dim), jnp.float32)
    # eps corresponds to torch.randn_like(mean) in reparametrize; generated
    # deterministically here and passed in so the kernel is pure.
    eps = jax.random.normal(k_eps, (B, z_dim), jnp.float32)

    ref = vae_forward_ref(x, eps, params)

    # 1) f32 validation path: bit-exact-ish vs the pure-JAX reference.
    outs_f32 = run_vae(x, eps, params, x_dim=x_dim, z_dim=z_dim,
                       compute_dtype=jnp.float32)
    for got, want in zip(outs_f32, ref):
        assert got.shape == want.shape, "shape mismatch vs reference (f32)"
        assert jnp.allclose(got, want, atol=1e-5, rtol=1e-5), "mismatch vs reference (f32)"

    # 2) Default bf16-operand path (MXU-native on v5e/v6e/v7x): loose tolerance.
    outs_bf16 = run_vae(x, eps, params, x_dim=x_dim, z_dim=z_dim,
                        compute_dtype=jnp.bfloat16)
    for got, want in zip(outs_bf16, ref):
        assert got.shape == want.shape, "shape mismatch vs reference (bf16)"
        assert jnp.allclose(got, want, atol=3e-2, rtol=3e-2), "mismatch vs reference (bf16)"

    print("KERNEL_OK")
</pallas_src>

<mosaic_0001>
module attributes {stable_mosaic.version = 11 : i64} {
  func.func @kernel(%arg0: i32, %arg1: memref<8x128xf32, #tpu.memory_space<vmem>>, %arg2: memref<8x128xf32, #tpu.memory_space<vmem>>, %arg3: memref<128x128xf32, #tpu.memory_space<vmem>>, %arg4: memref<1x128xf32, #tpu.memory_space<vmem>>, %arg5: memref<128x128xf32, #tpu.memory_space<vmem>>, %arg6: memref<1x128xf32, #tpu.memory_space<vmem>>, %arg7: memref<128x256xf32, #tpu.memory_space<vmem>>, %arg8: memref<1x256xf32, #tpu.memory_space<vmem>>, %arg9: memref<128x128xf32, #tpu.memory_space<vmem>>, %arg10: memref<1x128xf32, #tpu.memory_space<vmem>>, %arg11: memref<128x128xf32, #tpu.memory_space<vmem>>, %arg12: memref<1x128xf32, #tpu.memory_space<vmem>>, %arg13: memref<128x128xf32, #tpu.memory_space<vmem>>, %arg14: memref<1x128xf32, #tpu.memory_space<vmem>>, %arg15: memref<8x128xf32, #tpu.memory_space<vmem>>, %arg16: memref<8x384xf32, #tpu.memory_space<vmem>>) attributes {dimension_semantics = [#tpu.dimension_semantics<parallel>], iteration_bounds = array<i64: 1>, scalar_prefetch = 0 : i64, scratch_operands = 0 : i64, tpu.core_type = #tpu.core_type<tc>, window_params = [{transform_indices = @transform_0, window_bounds = array<i64: 8, 128>}, {transform_indices = @transform_1, window_bounds = array<i64: 8, 128>}, {pipeline_mode = #tpu.pipeline_mode<synchronous>, transform_indices = @transform_2, window_bounds = array<i64: 128, 128>}, {pipeline_mode = #tpu.pipeline_mode<synchronous>, transform_indices = @transform_3, window_bounds = array<i64: 1, 128>}, {pipeline_mode = #tpu.pipeline_mode<synchronous>, transform_indices = @transform_4, window_bounds = array<i64: 128, 128>}, {pipeline_mode = #tpu.pipeline_mode<synchronous>, transform_indices = @transform_5, window_bounds = array<i64: 1, 128>}, {pipeline_mode = #tpu.pipeline_mode<synchronous>, transform_indices = @transform_6, window_bounds = array<i64: 128, 256>}, {pipeline_mode = #tpu.pipeline_mode<synchronous>, transform_indices = @transform_7, window_bounds = array<i64: 1, 256>}, {pipeline_mode = #tpu.pipeline_mode<synchronous>, transform_indices = @transform_8, window_bounds = array<i64: 128, 128>}, {pipeline_mode = #tpu.pipeline_mode<synchronous>, transform_indices = @transform_9, window_bounds = array<i64: 1, 128>}, {pipeline_mode = #tpu.pipeline_mode<synchronous>, transform_indices = @transform_10, window_bounds = array<i64: 128, 128>}, {pipeline_mode = #tpu.pipeline_mode<synchronous>, transform_indices = @transform_11, window_bounds = array<i64: 1, 128>}, {pipeline_mode = #tpu.pipeline_mode<synchronous>, transform_indices = @transform_12, window_bounds = array<i64: 128, 128>}, {pipeline_mode = #tpu.pipeline_mode<synchronous>, transform_indices = @transform_13, window_bounds = array<i64: 1, 128>}, {transform_indices = @transform_14, window_bounds = array<i64: 8, 128>}, {transform_indices = @transform_15, window_bounds = array<i64: 8, 384>}]} {
    %c0 = arith.constant 0 : index
    %c0_0 = arith.constant 0 : index
    %0 = vector.load %arg1[%c0, %c0_0] : memref<8x128xf32, #tpu.memory_space<vmem>>, vector<8x128xf32>
    %c0_1 = arith.constant 0 : index
    %c0_2 = arith.constant 0 : index
    %1 = vector.load %arg2[%c0_1, %c0_2] : memref<8x128xf32, #tpu.memory_space<vmem>>, vector<8x128xf32>
    %c0_3 = arith.constant 0 : index
    %c0_4 = arith.constant 0 : index
    %2 = vector.load %arg3[%c0_3, %c0_4] : memref<128x128xf32, #tpu.memory_space<vmem>>, vector<128x128xf32>
    %cst = arith.constant dense<0.000000e+00> : vector<8x128xf32>
    %3 = tpu.matmul %0, %2, %cst {dimension_numbers = #tpu.dot_dimension_numbers<[1], [0], [0], [1], [0, 0, 1, 1], [], []>} : vector<8x128xf32>, vector<128x128xf32>, vector<8x128xf32> -> vector<8x128xf32>
    %c0_5 = arith.constant 0 : index
    %c0_6 = arith.constant 0 : index
    %4 = vector.load %arg4[%c0_5, %c0_6] : memref<1x128xf32, #tpu.memory_space<vmem>>, vector<1x128xf32>
    %5 = vector.broadcast %4 : vector<1x128xf32> to vector<8x128xf32>
    %6 = arith.addf %3, %5 : vector<8x128xf32>
    %cst_7 = arith.constant 0.000000e+00 : f32
    %7 = vector.broadcast %cst_7 : f32 to vector<8x128xf32>
    %8 = arith.maximumf %6, %7 : vector<8x128xf32>
    %c0_8 = arith.constant 0 : index
    %c0_9 = arith.constant 0 : index
    %9 = vector.load %arg5[%c0_8, %c0_9] : memref<128x128xf32, #tpu.memory_space<vmem>>, vector<128x128xf32>
    %cst_10 = arith.constant dense<0.000000e+00> : vector<8x128xf32>
    %10 = tpu.matmul %8, %9, %cst_10 {dimension_numbers = #tpu.dot_dimension_numbers<[1], [0], [0], [1], [0, 0, 1, 1], [], []>} : vector<8x128xf32>, vector<128x128xf32>, vector<8x128xf32> -> vector<8x128xf32>
    %c0_11 = arith.constant 0 : index
    %c0_12 = arith.constant 0 : index
    %11 = vector.load %arg6[%c0_11, %c0_12] : memref<1x128xf32, #tpu.memory_space<vmem>>, vector<1x128xf32>
    %12 = vector.broadcast %11 : vector<1x128xf32> to vector<8x128xf32>
    %13 = arith.addf %10, %12 : vector<8x128xf32>
    %cst_13 = arith.constant 0.000000e+00 : f32
    %14 = vector.broadcast %cst_13 : f32 to vector<8x128xf32>
    %15 = arith.maximumf %13, %14 : vector<8x128xf32>
    %c0_14 = arith.constant 0 : index
    %c0_15 = arith.constant 0 : index
    %16 = vector.load %arg7[%c0_14, %c0_15] : memref<128x256xf32, #tpu.memory_space<vmem>>, vector<128x256xf32>
    %cst_16 = arith.constant dense<0.000000e+00> : vector<8x256xf32>
    %17 = tpu.matmul %15, %16, %cst_16 {dimension_numbers = #tpu.dot_dimension_numbers<[1], [0], [0], [1], [0, 0, 1, 1], [], []>} : vector<8x128xf32>, vector<128x256xf32>, vector<8x256xf32> -> vector<8x256xf32>
    %c0_17 = arith.constant 0 : index
    %c0_18 = arith.constant 0 : index
    %18 = vector.load %arg8[%c0_17, %c0_18] : memref<1x256xf32, #tpu.memory_space<vmem>>, vector<1x256xf32>
    %19 = vector.broadcast %18 : vector<1x256xf32> to vector<8x256xf32>
    %20 = arith.addf %17, %19 : vector<8x256xf32>
    %21 = vector.extract_strided_slice %20 {offsets = [0, 0], sizes = [8, 128], strides = [1, 1]} : vector<8x256xf32> to vector<8x128xf32>
    %22 = vector.extract_strided_slice %20 {offsets = [0, 128], sizes = [8, 128], strides = [1, 1]} : vector<8x256xf32> to vector<8x128xf32>
    %cst_19 = arith.constant 5.000000e-01 : f32
    %23 = vector.broadcast %cst_19 : f32 to vector<8x128xf32>
    %24 = arith.mulf %22, %23 : vector<8x128xf32>
    %25 = math.exp %24 : vector<8x128xf32>
    %26 = arith.mulf %1, %25 : vector<8x128xf32>
    %27 = arith.addf %21, %26 : vector<8x128xf32>
    %c0_20 = arith.constant 0 : index
    %c0_21 = arith.constant 0 : index
    %28 = vector.load %arg16[%c0_20, %c0_21] : memref<8x384xf32, #tpu.memory_space<vmem>>, vector<8x256xf32>
    tpu.vector_store %arg16[%c0_20, %c0_21], %20 {strides = array<i32>} : memref<8x384xf32, #tpu.memory_space<vmem>>, vector<8x256xf32>,
    %c0_22 = arith.constant 0 : index
    %c256 = arith.constant 256 : index
    %29 = vector.load %arg16[%c0_22, %c256] : memref<8x384xf32, #tpu.memory_space<vmem>>, vector<8x128xf32>
    tpu.vector_store %arg16[%c0_22, %c256], %27 {strides = array<i32>} : memref<8x384xf32, #tpu.memory_space<vmem>>, vector<8x128xf32>,
    %c0_23 = arith.constant 0 : index
    %c0_24 = arith.constant 0 : index
    %30 = vector.load %arg9[%c0_23, %c0_24] : memref<128x128xf32, #tpu.memory_space<vmem>>, vector<128x128xf32>
    %cst_25 = arith.constant dense<0.000000e+00> : vector<8x128xf32>
    %31 = tpu.matmul %27, %30, %cst_25 {dimension_numbers = #tpu.dot_dimension_numbers<[1], [0], [0], [1], [0, 0, 1, 1], [], []>} : vector<8x128xf32>, vector<128x128xf32>, vector<8x128xf32> -> vector<8x128xf32>
    %c0_26 = arith.constant 0 : index
    %c0_27 = arith.constant 0 : index
    %32 = vector.load %arg10[%c0_26, %c0_27] : memref<1x128xf32, #tpu.memory_space<vmem>>, vector<1x128xf32>
    %33 = vector.broadcast %32 : vector<1x128xf32> to vector<8x128xf32>
    %34 = arith.addf %31, %33 : vector<8x128xf32>
    %cst_28 = arith.constant 0.000000e+00 : f32
    %35 = vector.broadcast %cst_28 : f32 to vector<8x128xf32>
    %36 = arith.maximumf %34, %35 : vector<8x128xf32>
    %c0_29 = arith.constant 0 : index
    %c0_30 = arith.constant 0 : index
    %37 = vector.load %arg11[%c0_29, %c0_30] : memref<128x128xf32, #tpu.memory_space<vmem>>, vector<128x128xf32>
    %cst_31 = arith.constant dense<0.000000e+00> : vector<8x128xf32>
    %38 = tpu.matmul %36, %37, %cst_31 {dimension_numbers = #tpu.dot_dimension_numbers<[1], [0], [0], [1], [0, 0, 1, 1], [], []>} : vector<8x128xf32>, vector<128x128xf32>, vector<8x128xf32> -> vector<8x128xf32>
    %c0_32 = arith.constant 0 : index
    %c0_33 = arith.constant 0 : index
    %39 = vector.load %arg12[%c0_32, %c0_33] : memref<1x128xf32, #tpu.memory_space<vmem>>, vector<1x128xf32>
    %40 = vector.broadcast %39 : vector<1x128xf32> to vector<8x128xf32>
    %41 = arith.addf %38, %40 : vector<8x128xf32>
    %cst_34 = arith.constant 0.000000e+00 : f32
    %42 = vector.broadcast %cst_34 : f32 to vector<8x128xf32>
    %43 = arith.maximumf %41, %42 : vector<8x128xf32>
    %c0_35 = arith.constant 0 : index
    %c0_36 = arith.constant 0 : index
    %44 = vector.load %arg13[%c0_35, %c0_36] : memref<128x128xf32, #tpu.memory_space<vmem>>, vector<128x128xf32>
    %cst_37 = arith.constant dense<0.000000e+00> : vector<8x128xf32>
    %45 = tpu.matmul %43, %44, %cst_37 {dimension_numbers = #tpu.dot_dimension_numbers<[1], [0], [0], [1], [0, 0, 1, 1], [], []>} : vector<8x128xf32>, vector<128x128xf32>, vector<8x128xf32> -> vector<8x128xf32>
    %c0_38 = arith.constant 0 : index
    %c0_39 = arith.constant 0 : index
    %46 = vector.load %arg14[%c0_38, %c0_39] : memref<1x128xf32, #tpu.memory_space<vmem>>, vector<1x128xf32>
    %47 = vector.broadcast %46 : vector<1x128xf32> to vector<8x128xf32>
    %48 = arith.addf %45, %47 : vector<8x128xf32>
    %49 = arith.negf %48 : vector<8x128xf32>
    %50 = math.exp %49 : vector<8x128xf32>
    %cst_40 = arith.constant 1.000000e+00 : f32
    %51 = vector.broadcast %cst_40 : f32 to vector<8x128xf32>
    %52 = arith.addf %51, %50 : vector<8x128xf32>
    %53 = arith.divf %51, %52 : vector<8x128xf32>
    %c0_41 = arith.constant 0 : index
    %c0_42 = arith.constant 0 : index
    %54 = vector.load %arg15[%c0_41, %c0_42] : memref<8x128xf32, #tpu.memory_space<vmem>>, vector<8x128xf32>
    tpu.vector_store %arg15[%c0_41, %c0_42], %53 {strides = array<i32>} : memref<8x128xf32, #tpu.memory_space<vmem>>, vector<8x128xf32>,
    return
  }
  func.func @transform_0(%arg0: i32) -> (i32, i32) {
    %c0_i32 = arith.constant 0 : i32
    %c0_i32_0 = arith.constant 0 : i32
    return %arg0, %c0_i32 : i32, i32
  }
  func.func @transform_1(%arg0: i32) -> (i32, i32) {
    %c0_i32 = arith.constant 0 : i32
    %c0_i32_0 = arith.constant 0 : i32
    return %arg0, %c0_i32 : i32, i32
  }
  func.func @transform_2(%arg0: i32) -> (i32, i32) {
    %c0_i32 = arith.constant 0 : i32
    %c0_i32_0 = arith.constant 0 : i32
    %c0_i32_1 = arith.constant 0 : i32
    return %c0_i32, %c0_i32_0 : i32, i32
  }
  func.func @transform_3(%arg0: i32) -> (i32, i32) {
    %c0_i32 = arith.constant 0 : i32
    %c0_i32_0 = arith.constant 0 : i32
    %c0_i32_1 = arith.constant 0 : i32
    return %c0_i32, %c0_i32_0 : i32, i32
  }
  func.func @transform_4(%arg0: i32) -> (i32, i32) {
    %c0_i32 = arith.constant 0 : i32
    %c0_i32_0 = arith.constant 0 : i32
    %c0_i32_1 = arith.constant 0 : i32
    return %c0_i32, %c0_i32_0 : i32, i32
  }
  func.func @transform_5(%arg0: i32) -> (i32, i32) {
    %c0_i32 = arith.constant 0 : i32
    %c0_i32_0 = arith.constant 0 : i32
    %c0_i32_1 = arith.constant 0 : i32
    return %c0_i32, %c0_i32_0 : i32, i32
  }
  func.func @transform_6(%arg0: i32) -> (i32, i32) {
    %c0_i32 = arith.constant 0 : i32
    %c0_i32_0 = arith.constant 0 : i32
    %c0_i32_1 = arith.constant 0 : i32
    return %c0_i32, %c0_i32_0 : i32, i32
  }
  func.func @transform_7(%arg0: i32) -> (i32, i32) {
    %c0_i32 = arith.constant 0 : i32
    %c0_i32_0 = arith.constant 0 : i32
    %c0_i32_1 = arith.constant 0 : i32
    return %c0_i32, %c0_i32_0 : i32, i32
  }
  func.func @transform_8(%arg0: i32) -> (i32, i32) {
    %c0_i32 = arith.constant 0 : i32
    %c0_i32_0 = arith.constant 0 : i32
    %c0_i32_1 = arith.constant 0 : i32
    return %c0_i32, %c0_i32_0 : i32, i32
  }
  func.func @transform_9(%arg0: i32) -> (i32, i32) {
    %c0_i32 = arith.constant 0 : i32
    %c0_i32_0 = arith.constant 0 : i32
    %c0_i32_1 = arith.constant 0 : i32
    return %c0_i32, %c0_i32_0 : i32, i32
  }
  func.func @transform_10(%arg0: i32) -> (i32, i32) {
    %c0_i32 = arith.constant 0 : i32
    %c0_i32_0 = arith.constant 0 : i32
    %c0_i32_1 = arith.constant 0 : i32
    return %c0_i32, %c0_i32_0 : i32, i32
  }
  func.func @transform_11(%arg0: i32) -> (i32, i32) {
    %c0_i32 = arith.constant 0 : i32
    %c0_i32_0 = arith.constant 0 : i32
    %c0_i32_1 = arith.constant 0 : i32
    return %c0_i32, %c0_i32_0 : i32, i32
  }
  func.func @transform_12(%arg0: i32) -> (i32, i32) {
    %c0_i32 = arith.constant 0 : i32
    %c0_i32_0 = arith.constant 0 : i32
    %c0_i32_1 = arith.constant 0 : i32
    return %c0_i32, %c0_i32_0 : i32, i32
  }
  func.func @transform_13(%arg0: i32) -> (i32, i32) {
    %c0_i32 = arith.constant 0 : i32
    %c0_i32_0 = arith.constant 0 : i32
    %c0_i32_1 = arith.constant 0 : i32
    return %c0_i32, %c0_i32_0 : i32, i32
  }
  func.func @transform_14(%arg0: i32) -> (i32, i32) {
    %c0_i32 = arith.constant 0 : i32
    %c0_i32_0 = arith.constant 0 : i32
    return %arg0, %c0_i32 : i32, i32
  }
  func.func @transform_15(%arg0: i32) -> (i32, i32) {
    %c0_i32 = arith.constant 0 : i32
    %c0_i32_0 = arith.constant 0 : i32
    return %arg0, %c0_i32 : i32, i32
  }
}

module attributes {stable_mosaic.version = 11 : i64} {
  func.func @kernel(%arg0: i32, %arg1: memref<8x128xf32, #tpu.memory_space<vmem>>, %arg2: memref<8x128xf32, #tpu.memory_space<vmem>>, %arg3: memref<128x128xf32, #tpu.memory_space<vmem>>, %arg4: memref<1x128xf32, #tpu.memory_space<vmem>>, %arg5: memref<128x128xf32, #tpu.memory_space<vmem>>, %arg6: memref<1x128xf32, #tpu.memory_space<vmem>>, %arg7: memref<128x256xf32, #tpu.memory_space<vmem>>, %arg8: memref<1x256xf32, #tpu.memory_space<vmem>>, %arg9: memref<128x128xf32, #tpu.memory_space<vmem>>, %arg10: memref<1x128xf32, #tpu.memory_space<vmem>>, %arg11: memref<128x128xf32, #tpu.memory_space<vmem>>, %arg12: memref<1x128xf32, #tpu.memory_space<vmem>>, %arg13: memref<128x128xf32, #tpu.memory_space<vmem>>, %arg14: memref<1x128xf32, #tpu.memory_space<vmem>>, %arg15: memref<8x128xf32, #tpu.memory_space<vmem>>, %arg16: memref<8x384xf32, #tpu.memory_space<vmem>>) attributes {dimension_semantics = [#tpu.dimension_semantics<parallel>], iteration_bounds = array<i64: 1>, scalar_prefetch = 0 : i64, scratch_operands = 0 : i64, tpu.core_type = #tpu.core_type<tc>, window_params = [{transform_indices = @transform_0, window_bounds = array<i64: 8, 128>}, {transform_indices = @transform_1, window_bounds = array<i64: 8, 128>}, {pipeline_mode = #tpu.pipeline_mode<synchronous>, transform_indices = @transform_2, window_bounds = array<i64: 128, 128>}, {pipeline_mode = #tpu.pipeline_mode<synchronous>, transform_indices = @transform_3, window_bounds = array<i64: 1, 128>}, {pipeline_mode = #tpu.pipeline_mode<synchronous>, transform_indices = @transform_4, window_bounds = array<i64: 128, 128>}, {pipeline_mode = #tpu.pipeline_mode<synchronous>, transform_indices = @transform_5, window_bounds = array<i64: 1, 128>}, {pipeline_mode = #tpu.pipeline_mode<synchronous>, transform_indices = @transform_6, window_bounds = array<i64: 128, 256>}, {pipeline_mode = #tpu.pipeline_mode<synchronous>, transform_indices = @transform_7, window_bounds = array<i64: 1, 256>}, {pipeline_mode = #tpu.pipeline_mode<synchronous>, transform_indices = @transform_8, window_bounds = array<i64: 128, 128>}, {pipeline_mode = #tpu.pipeline_mode<synchronous>, transform_indices = @transform_9, window_bounds = array<i64: 1, 128>}, {pipeline_mode = #tpu.pipeline_mode<synchronous>, transform_indices = @transform_10, window_bounds = array<i64: 128, 128>}, {pipeline_mode = #tpu.pipeline_mode<synchronous>, transform_indices = @transform_11, window_bounds = array<i64: 1, 128>}, {pipeline_mode = #tpu.pipeline_mode<synchronous>, transform_indices = @transform_12, window_bounds = array<i64: 128, 128>}, {pipeline_mode = #tpu.pipeline_mode<synchronous>, transform_indices = @transform_13, window_bounds = array<i64: 1, 128>}, {transform_indices = @transform_14, window_bounds = array<i64: 8, 128>}, {transform_indices = @transform_15, window_bounds = array<i64: 8, 384>}]} {
    %c0 = arith.constant 0 : index
    %c0_0 = arith.constant 0 : index
    %0 = vector.load %arg1[%c0, %c0_0] : memref<8x128xf32, #tpu.memory_space<vmem>>, vector<8x128xf32>
    %c0_1 = arith.constant 0 : index
    %c0_2 = arith.constant 0 : index
    %1 = vector.load %arg2[%c0_1, %c0_2] : memref<8x128xf32, #tpu.memory_space<vmem>>, vector<8x128xf32>
    %c0_3 = arith.constant 0 : index
    %c0_4 = arith.constant 0 : index
    %2 = vector.load %arg3[%c0_3, %c0_4] : memref<128x128xf32, #tpu.memory_space<vmem>>, vector<128x128xf32>
    %cst = arith.constant dense<0.000000e+00> : vector<8x128xf32>
    %3 = tpu.matmul %0, %2, %cst {dimension_numbers = #tpu.dot_dimension_numbers<[1], [0], [0], [1], [0, 0, 1, 1], [], []>} : vector<8x128xf32>, vector<128x128xf32>, vector<8x128xf32> -> vector<8x128xf32>
    %c0_5 = arith.constant 0 : index
    %c0_6 = arith.constant 0 : index
    %4 = vector.load %arg4[%c0_5, %c0_6] : memref<1x128xf32, #tpu.memory_space<vmem>>, vector<1x128xf32>
    %5 = vector.broadcast %4 : vector<1x128xf32> to vector<8x128xf32>
    %6 = arith.addf %3, %5 : vector<8x128xf32>
    %cst_7 = arith.constant 0.000000e+00 : f32
    %7 = vector.broadcast %cst_7 : f32 to vector<8x128xf32>
    %8 = arith.maximumf %6, %7 : vector<8x128xf32>
    %c0_8 = arith.constant 0 : index
    %c0_9 = arith.constant 0 : index
    %9 = vector.load %arg5[%c0_8, %c0_9] : memref<128x128xf32, #tpu.memory_space<vmem>>, vector<128x128xf32>
    %cst_10 = arith.constant dense<0.000000e+00> : vector<8x128xf32>
    %10 = tpu.matmul %8, %9, %cst_10 {dimension_numbers = #tpu.dot_dimension_numbers<[1], [0], [0], [1], [0, 0, 1, 1], [], []>} : vector<8x128xf32>, vector<128x128xf32>, vector<8x128xf32> -> vector<8x128xf32>
    %c0_11 = arith.constant 0 : index
    %c0_12 = arith.constant 0 : index
    %11 = vector.load %arg6[%c0_11, %c0_12] : memref<1x128xf32, #tpu.memory_space<vmem>>, vector<1x128xf32>
    %12 = vector.broadcast %11 : vector<1x128xf32> to vector<8x128xf32>
    %13 = arith.addf %10, %12 : vector<8x128xf32>
    %cst_13 = arith.constant 0.000000e+00 : f32
    %14 = vector.broadcast %cst_13 : f32 to vector<8x128xf32>
    %15 = arith.maximumf %13, %14 : vector<8x128xf32>
    %c0_14 = arith.constant 0 : index
    %c0_15 = arith.constant 0 : index
    %16 = vector.load %arg7[%c0_14, %c0_15] : memref<128x256xf32, #tpu.memory_space<vmem>>, vector<128x256xf32>
    %cst_16 = arith.constant dense<0.000000e+00> : vector<8x256xf32>
    %17 = tpu.matmul %15, %16, %cst_16 {dimension_numbers = #tpu.dot_dimension_numbers<[1], [0], [0], [1], [0, 0, 1, 1], [], []>} : vector<8x128xf32>, vector<128x256xf32>, vector<8x256xf32> -> vector<8x256xf32>
    %c0_17 = arith.constant 0 : index
    %c0_18 = arith.constant 0 : index
    %18 = vector.load %arg8[%c0_17, %c0_18] : memref<1x256xf32, #tpu.memory_space<vmem>>, vector<1x256xf32>
    %19 = vector.broadcast %18 : vector<1x256xf32> to vector<8x256xf32>
    %20 = arith.addf %17, %19 : vector<8x256xf32>
    %21 = vector.extract_strided_slice %20 {offsets = [0, 0], sizes = [8, 128], strides = [1, 1]} : vector<8x256xf32> to vector<8x128xf32>
    %22 = vector.extract_strided_slice %20 {offsets = [0, 128], sizes = [8, 128], strides = [1, 1]} : vector<8x256xf32> to vector<8x128xf32>
    %cst_19 = arith.constant 5.000000e-01 : f32
    %23 = vector.broadcast %cst_19 : f32 to vector<8x128xf32>
    %24 = arith.mulf %22, %23 : vector<8x128xf32>
    %25 = math.exp %24 : vector<8x128xf32>
    %26 = arith.mulf %1, %25 : vector<8x128xf32>
    %27 = arith.addf %21, %26 : vector<8x128xf32>
    %c0_20 = arith.constant 0 : index
    %c0_21 = arith.constant 0 : index
    %28 = vector.load %arg16[%c0_20, %c0_21] : memref<8x384xf32, #tpu.memory_space<vmem>>, vector<8x256xf32>
    tpu.vector_store %arg16[%c0_20, %c0_21], %20 {strides = array<i32>} : memref<8x384xf32, #tpu.memory_space<vmem>>, vector<8x256xf32>,
    %c0_22 = arith.constant 0 : index
    %c256 = arith.constant 256 : index
    %29 = vector.load %arg16[%c0_22, %c256] : memref<8x384xf32, #tpu.memory_space<vmem>>, vector<8x128xf32>
    tpu.vector_store %arg16[%c0_22, %c256], %27 {strides = array<i32>} : memref<8x384xf32, #tpu.memory_space<vmem>>, vector<8x128xf32>,
    %c0_23 = arith.constant 0 : index
    %c0_24 = arith.constant 0 : index
    %30 = vector.load %arg9[%c0_23, %c0_24] : memref<128x128xf32, #tpu.memory_space<vmem>>, vector<128x128xf32>
    %cst_25 = arith.constant dense<0.000000e+00> : vector<8x128xf32>
    %31 = tpu.matmul %27, %30, %cst_25 {dimension_numbers = #tpu.dot_dimension_numbers<[1], [0], [0], [1], [0, 0, 1, 1], [], []>} : vector<8x128xf32>, vector<128x128xf32>, vector<8x128xf32> -> vector<8x128xf32>
    %c0_26 = arith.constant 0 : index
    %c0_27 = arith.constant 0 : index
    %32 = vector.load %arg10[%c0_26, %c0_27] : memref<1x128xf32, #tpu.memory_space<vmem>>, vector<1x128xf32>
    %33 = vector.broadcast %32 : vector<1x128xf32> to vector<8x128xf32>
    %34 = arith.addf %31, %33 : vector<8x128xf32>
    %cst_28 = arith.constant 0.000000e+00 : f32
    %35 = vector.broadcast %cst_28 : f32 to vector<8x128xf32>
    %36 = arith.maximumf %34, %35 : vector<8x128xf32>
    %c0_29 = arith.constant 0 : index
    %c0_30 = arith.constant 0 : index
    %37 = vector.load %arg11[%c0_29, %c0_30] : memref<128x128xf32, #tpu.memory_space<vmem>>, vector<128x128xf32>
    %cst_31 = arith.constant dense<0.000000e+00> : vector<8x128xf32>
    %38 = tpu.matmul %36, %37, %cst_31 {dimension_numbers = #tpu.dot_dimension_numbers<[1], [0], [0], [1], [0, 0, 1, 1], [], []>} : vector<8x128xf32>, vector<128x128xf32>, vector<8x128xf32> -> vector<8x128xf32>
    %c0_32 = arith.constant 0 : index
    %c0_33 = arith.constant 0 : index
    %39 = vector.load %arg12[%c0_32, %c0_33] : memref<1x128xf32, #tpu.memory_space<vmem>>, vector<1x128xf32>
    %40 = vector.broadcast %39 : vector<1x128xf32> to vector<8x128xf32>
    %41 = arith.addf %38, %40 : vector<8x128xf32>
    %cst_34 = arith.constant 0.000000e+00 : f32
    %42 = vector.broadcast %cst_34 : f32 to vector<8x128xf32>
    %43 = arith.maximumf %41, %42 : vector<8x128xf32>
    %c0_35 = arith.constant 0 : index
    %c0_36 = arith.constant 0 : index
    %44 = vector.load %arg13[%c0_35, %c0_36] : memref<128x128xf32, #tpu.memory_space<vmem>>, vector<128x128xf32>
    %cst_37 = arith.constant dense<0.000000e+00> : vector<8x128xf32>
    %45 = tpu.matmul %43, %44, %cst_37 {dimension_numbers = #tpu.dot_dimension_numbers<[1], [0], [0], [1], [0, 0, 1, 1], [], []>} : vector<8x128xf32>, vector<128x128xf32>, vector<8x128xf32> -> vector<8x128xf32>
    %c0_38 = arith.constant 0 : index
    %c0_39 = arith.constant 0 : index
    %46 = vector.load %arg14[%c0_38, %c0_39] : memref<1x128xf32, #tpu.memory_space<vmem>>, vector<1x128xf32>
    %47 = vector.broadcast %46 : vector<1x128xf32> to vector<8x128xf32>
    %48 = arith.addf %45, %47 : vector<8x128xf32>
    %49 = arith.negf %48 : vector<8x128xf32>
    %50 = math.exp %49 : vector<8x128xf32>
    %cst_40 = arith.constant 1.000000e+00 : f32
    %51 = vector.broadcast %cst_40 : f32 to vector<8x128xf32>
    %52 = arith.addf %51, %50 : vector<8x128xf32>
    %53 = arith.divf %51, %52 : vector<8x128xf32>
    %c0_41 = arith.constant 0 : index
    %c0_42 = arith.constant 0 : index
    %54 = vector.load %arg15[%c0_41, %c0_42] : memref<8x128xf32, #tpu.memory_space<vmem>>, vector<8x128xf32>
    tpu.vector_store %arg15[%c0_41, %c0_42], %53 {strides = array<i32>} : memref<8x128xf32, #tpu.memory_space<vmem>>, vector<8x128xf32>,
    return
  }
  func.func @transform_0(%arg0: i32) -> (i32, i32) {
    %c0_i32 = arith.constant 0 : i32
    %c0_i32_0 = arith.constant 0 : i32
    return %arg0, %c0_i32 : i32, i32
  }
  func.func @transform_1(%arg0: i32) -> (i32, i32) {
    %c0_i32 = arith.constant 0 : i32
    %c0_i32_0 = arith.constant 0 : i32
    return %arg0, %c0_i32 : i32, i32
  }
  func.func @transform_2(%arg0: i32) -> (i32, i32) {
    %c0_i32 = arith.constant 0 : i32
    %c0_i32_0 = arith.constant 0 : i32
    %c0_i32_1 = arith.constant 0 : i32
    return %c0_i32, %c0_i32_0 : i32, i32
  }
  func.func @transform_3(%arg0: i32) -> (i32, i32) {
    %c0_i32 = arith.constant 0 : i32
    %c0_i32_0 = arith.constant 0 : i32
    %c0_i32_1 = arith.constant 0 : i32
    return %c0_i32, %c0_i32_0 : i32, i32
  }
  func.func @transform_4(%arg0: i32) -> (i32, i32) {
    %c0_i32 = arith.constant 0 : i32
    %c0_i32_0 = arith.constant 0 : i32
    %c0_i32_1 = arith.constant 0 : i32
    return %c0_i32, %c0_i32_0 : i32, i32
  }
  func.func @transform_5(%arg0: i32) -> (i32, i32) {
    %c0_i32 = arith.constant 0 : i32
    %c0_i32_0 = arith.constant 0 : i32
    %c0_i32_1 = arith.constant 0 : i32
    return %c0_i32, %c0_i32_0 : i32, i32
  }
  func.func @transform_6(%arg0: i32) -> (i32, i32) {
    %c0_i32 = arith.constant 0 : i32
    %c0_i32_0 = arith.constant 0 : i32
    %c0_i32_1 = arith.constant 0 : i32
    return %c0_i32, %c0_i32_0 : i32, i32
  }
  func.func @transform_7(%arg0: i32) -> (i32, i32) {
    %c0_i32 = arith.constant 0 : i32
    %c0_i32_0 = arith.constant 0 : i32
    %c0_i32_1 = arith.constant 0 : i32
    return %c0_i32, %c0_i32_0 : i32, i32
  }
  func.func @transform_8(%arg0: i32) -> (i32, i32) {
    %c0_i32 = arith.constant 0 : i32
    %c0_i32_0 = arith.constant 0 : i32
    %c0_i32_1 = arith.constant 0 : i32
    return %c0_i32, %c0_i32_0 : i32, i32
  }
  func.func @transform_9(%arg0: i32) -> (i32, i32) {
    %c0_i32 = arith.constant 0 : i32
    %c0_i32_0 = arith.constant 0 : i32
    %c0_i32_1 = arith.constant 0 : i32
    return %c0_i32, %c0_i32_0 : i32, i32
  }
  func.func @transform_10(%arg0: i32) -> (i32, i32) {
    %c0_i32 = arith.constant 0 : i32
    %c0_i32_0 = arith.constant 0 : i32
    %c0_i32_1 = arith.constant 0 : i32
    return %c0_i32, %c0_i32_0 : i32, i32
  }
  func.func @transform_11(%arg0: i32) -> (i32, i32) {
    %c0_i32 = arith.constant 0 : i32
    %c0_i32_0 = arith.constant 0 : i32
    %c0_i32_1 = arith.constant 0 : i32
    return %c0_i32, %c0_i32_0 : i32, i32
  }
  func.func @transform_12(%arg0: i32) -> (i32, i32) {
    %c0_i32 = arith.constant 0 : i32
    %c0_i32_0 = arith.constant 0 : i32
    %c0_i32_1 = arith.constant 0 : i32
    return %c0_i32, %c0_i32_0 : i32, i32
  }
  func.func @transform_13(%arg0: i32) -> (i32, i32) {
    %c0_i32 = arith.constant 0 : i32
    %c0_i32_0 = arith.constant 0 : i32
    %c0_i32_1 = arith.constant 0 : i32
    return %c0_i32, %c0_i32_0 : i32, i32
  }
  func.func @transform_14(%arg0: i32) -> (i32, i32) {
    %c0_i32 = arith.constant 0 : i32
    %c0_i32_0 = arith.constant 0 : i32
    return %arg0, %c0_i32 : i32, i32
  }
  func.func @transform_15(%arg0: i32) -> (i32, i32) {
    %c0_i32 = arith.constant 0 : i32
    %c0_i32_0 = arith.constant 0 : i32
    return %arg0, %c0_i32 : i32, i32
  }
}

</mosaic_0001>

<bundles_post_ra>
// kernel: vae_forward.1
= control target key start
LH: loop header
LB: loop body
LE: loop exit
PB: predicated region body
PF: predicated region fallthrough
CT: control target
= control target key end

     0   :  { %v966_v1 = vmov 0.0   ;;  %vm967_vm0 = vmmov 0   ;;  %s1512_s0 = inlined_call_operand.vmem [shape: f32[8,128], index: 0, kind: input, shape index: {}]   ;;  %s1513_s1 = inlined_call_operand.vmem [shape: f32[8,128], index: 1, kind: input, shape index: {}]   ;;  %s1514_s2 = inlined_call_operand.vmem [shape: f32[128,128], index: 2, kind: input, shape index: {}]   ;;  %s1515_s3 = inlined_call_operand.vmem [shape: f32[1,128], index: 3, kind: input, shape index: {}]   ;;  %s1516_s4 = inlined_call_operand.vmem [shape: f32[128,128], index: 4, kind: input, shape index: {}]   ;;  %s1517_s5 = inlined_call_operand.vmem [shape: f32[1,128], index: 5, kind: input, shape index: {}]   ;;  %s1518_s6 = inlined_call_operand.vmem [shape: f32[128,256], index: 6, kind: input, shape index: {}]   ;;  %s1519_s7 = inlined_call_operand.vmem [shape: f32[1,256], index: 7, kind: input, shape index: {}]   ;;  %s1520_s8 = inlined_call_operand.vmem [shape: f32[128,128], index: 8, kind: input, shape index: {}]   ;;  %s1521_s9 = inlined_call_operand.vmem [shape: f32[1,128], index: 9, kind: input, shape index: {}]   ;;  %s1522_s10 = inlined_call_operand.vmem [shape: f32[128,128], index: 10, kind: input, shape index: {}]   ;;  %s1523_s11 = inlined_call_operand.vmem [shape: f32[1,128], index: 11, kind: input, shape index: {}]   ;;  %s1524_s12 = inlined_call_operand.vmem [shape: f32[128,128], index: 12, kind: input, shape index: {}]   ;;  %s1525_s13 = inlined_call_operand.vmem [shape: f32[1,128], index: 13, kind: input, shape index: {}]   ;;  %s1526_s14 = inlined_call_operand.hbm [shape: f32[8,128], index: 14, kind: output, shape index: {0}]   ;;  %s1527_s15 = inlined_call_operand.vmem [shape: f32[8,384], index: 15, kind: output, shape index: {1}]  }
   0x1   :  { %v67_v0 = vld [vmem:[%s1514_s2 + $0x78] sm:$0xff]  ;;  %760 = vmatprep.subr.mxu0 %v966_v1  ;;  %v66_v2 = vld [vmem:[%s1514_s2 + $0x70] sm:$0xff]  ;;  %792 = vmatprep.mubr.msk.f32.mxu0 %vm967_vm0, %v966_v1  ;;  %v65_v3 = vld [vmem:[%s1514_s2 + $0x68] sm:$0xff] }
   0x2   :  { %761 = vmatpush3.msra.mxu0 %v67_v0  ;;  %795 = vmatprep.subr.mxu1 %v966_v1  ;;  %v64_v4 = vld [vmem:[%s1514_s2 + $0x60] sm:$0xff]  ;;  %v161_v5 = vld [vmem:[%s1516_s4 + $0x78] sm:$0xff]  ;;  %v160_v6 = vld [vmem:[%s1516_s4 + $0x70] sm:$0xff] }
   0x3   :  { %762 = vmatprep.subr.mxu0 %v966_v1  ;;  %827 = vmatprep.mubr.msk.f32.mxu1 %vm967_vm0, %v966_v1  ;;  %v63_v7 = vld [vmem:[%s1514_s2 + $0x58] sm:$0xff]  ;;  %v159_v8 = vld [vmem:[%s1516_s4 + $0x68] sm:$0xff]  ;;  %v62_v9 = vld [vmem:[%s1514_s2 + $0x50] sm:$0xff] }
   0x4   :  { %763 = vmatpush3.msra.mxu0 %v66_v2  ;;  %796 = vmatpush3.msra.mxu1 %v161_v5  ;;  %v158_v10 = vld [vmem:[%s1516_s4 + $0x60] sm:$0xff] }
   0x5   :  { %764 = vmatprep.subr.mxu0 %v966_v1  ;;  %797 = vmatprep.subr.mxu1 %v966_v1 }
   0x6   :  { %765 = vmatpush3.msra.mxu0 %v65_v3  ;;  %798 = vmatpush3.msra.mxu1 %v160_v6 }
   0x7   :  { %766 = vmatprep.subr.mxu0 %v966_v1  ;;  %799 = vmatprep.subr.mxu1 %v966_v1 }
   0x8   :  { %767 = vmatpush3.msra.mxu0 %v64_v4  ;;  %800 = vmatpush3.msra.mxu1 %v159_v8 }
   0x9   :  { %768 = vmatprep.subr.mxu0 %v966_v1 }
   0xa   :  { %769 = vmatpush3.msra.mxu0 %v63_v7 }
   0xb   :  { %21 = vsyncpa [#allocation3], 0  ;;  %770 = vmatprep.subr.mxu0 %v966_v1  ;;  %v61_v11 = vld [vmem:[%s1514_s2 + $0x48] sm:$0xff]  ;;  %801 = vmatprep.subr.mxu1 %v966_v1  ;;  %v157_v12 = vld [vmem:[%s1516_s4 + $0x58] sm:$0xff] }
   0xc   :  { %771 = vmatpush3.msra.mxu0 %v62_v9  ;;  %802 = vmatpush3.msra.mxu1 %v158_v10  ;;  %v60_v13 = vld [vmem:[%s1514_s2 + $0x40] sm:$0xff]  ;;  %v156_v14 = vld [vmem:[%s1516_s4 + $0x50] sm:$0xff]  ;;  %v59_v15 = vld [vmem:[%s1514_s2 + $0x38] sm:$0xff] }
   0xd   :  { %772 = vmatprep.subr.mxu0 %v966_v1  ;;  %803 = vmatprep.subr.mxu1 %v966_v1  ;;  %v155_v16 = vld [vmem:[%s1516_s4 + $0x48] sm:$0xff]  ;;  %v58_v17 = vld [vmem:[%s1514_s2 + $0x30] sm:$0xff]  ;;  %v154_v18 = vld [vmem:[%s1516_s4 + $0x40] sm:$0xff] }
   0xe   :  { %773 = vmatpush3.msra.mxu0 %v61_v11  ;;  %804 = vmatpush3.msra.mxu1 %v157_v12  ;;  %v57_v19 = vld [vmem:[%s1514_s2 + $0x28] sm:$0xff]  ;;  %v153_v20 = vld [vmem:[%s1516_s4 + $0x38] sm:$0xff]  ;;  %v56_v21 = vld [vmem:[%s1514_s2 + $0x20] sm:$0xff] }
   0xf   :  { %774 = vmatprep.subr.mxu0 %v966_v1  ;;  %805 = vmatprep.subr.mxu1 %v966_v1  ;;  %v152_v22 = vld [vmem:[%s1516_s4 + $0x30] sm:$0xff]  ;;  %v55_v23 = vld [vmem:[%s1514_s2 + $0x18] sm:$0xff]  ;;  %v151_v24 = vld [vmem:[%s1516_s4 + $0x28] sm:$0xff] }
  0x10   :  { %775 = vmatpush3.msra.mxu0 %v60_v13  ;;  %806 = vmatpush3.msra.mxu1 %v156_v14  ;;  %v54_v25 = vld [vmem:[%s1514_s2 + $0x10] sm:$0xff]  ;;  %v150_v26 = vld [vmem:[%s1516_s4 + $0x20] sm:$0xff]  ;;  %v53_v27 = vld [vmem:[%s1514_s2 + $0x8] sm:$0xff] }
  0x11   :  { %776 = vmatprep.subr.mxu0 %v966_v1  ;;  %807 = vmatprep.subr.mxu1 %v966_v1  ;;  %v149_v28 = vld [vmem:[%s1516_s4 + $0x18] sm:$0xff]  ;;  %v52_v29 = vld [vmem:[%s1514_s2] sm:$0xff]  ;;  %v148_v31 = vld [vmem:[%s1516_s4 + $0x10] sm:$0xff] }
  0x12   :  { %777 = vmatpush3.msra.mxu0 %v59_v15  ;;  %808 = vmatpush3.msra.mxu1 %v155_v16  ;;  %v50_v30 = vld [vmem:[%s1512_s0] sm:$0xff]  ;;  %v147_v32 = vld [vmem:[%s1516_s4 + $0x8] sm:$0xff]  ;;  %v271_v34 = vld [vmem:[%s1518_s6 + $0xf8] sm:$0xff] }
  0x13   :  { %778 = vmatprep.subr.mxu0 %v966_v1  ;;  %809 = vmatprep.subr.mxu1 %v966_v1  ;;  %v146_v33 = vld [vmem:[%s1516_s4] sm:$0xff]  ;;  %v270_v35 = vld [vmem:[%s1518_s6 + $0xf0] sm:$0xff]  ;;  %v269_v36 = vld [vmem:[%s1518_s6 + $0xe8] sm:$0xff] }
  0x14   :  { %779 = vmatpush3.msra.mxu0 %v58_v17  ;;  %810 = vmatpush3.msra.mxu1 %v154_v18  ;;  %v268_v37 = vld [vmem:[%s1518_s6 + $0xe0] sm:$0xff]  ;;  %v267_v38 = vld [vmem:[%s1518_s6 + $0xd8] sm:$0xff]  ;;  %v266_v39 = vld [vmem:[%s1518_s6 + $0xd0] sm:$0xff] }
  0x15   :  { %780 = vmatprep.subr.mxu0 %v966_v1  ;;  %811 = vmatprep.subr.mxu1 %v966_v1  ;;  %v265_v40 = vld [vmem:[%s1518_s6 + $0xc8] sm:$0xff]  ;;  %v264_v41 = vld [vmem:[%s1518_s6 + $0xc0] sm:$0xff]  ;;  %v263_v42 = vld [vmem:[%s1518_s6 + $0xb8] sm:$0xff] }
  0x16   :  { %781 = vmatpush3.msra.mxu0 %v57_v19  ;;  %812 = vmatpush3.msra.mxu1 %v153_v20  ;;  %v262_v43 = vld [vmem:[%s1518_s6 + $0xb0] sm:$0xff]  ;;  %v261_v44 = vld [vmem:[%s1518_s6 + $0xa8] sm:$0xff]  ;;  %v260_v45 = vld [vmem:[%s1518_s6 + $0xa0] sm:$0xff] }
  0x17   :  { %782 = vmatprep.subr.mxu0 %v966_v1  ;;  %813 = vmatprep.subr.mxu1 %v966_v1  ;;  %v259_v46 = vld [vmem:[%s1518_s6 + $0x98] sm:$0xff]  ;;  %v258_v47 = vld [vmem:[%s1518_s6 + $0x90] sm:$0xff]  ;;  %v257_v48 = vld [vmem:[%s1518_s6 + $0x88] sm:$0xff] }
  0x18   :  { %783 = vmatpush3.msra.mxu0 %v56_v21  ;;  %814 = vmatpush3.msra.mxu1 %v152_v22  ;;  %v256_v49 = vld [vmem:[%s1518_s6 + $0x80] sm:$0xff]  ;;  %v255_v50 = vld [vmem:[%s1518_s6 + $0x78] sm:$0xff]  ;;  %v254_v51 = vld [vmem:[%s1518_s6 + $0x70] sm:$0xff] }
  0x19   :  { %784 = vmatprep.subr.mxu0 %v966_v1  ;;  %815 = vmatprep.subr.mxu1 %v966_v1  ;;  %v253_v52 = vld [vmem:[%s1518_s6 + $0x68] sm:$0xff]  ;;  %v252_v53 = vld [vmem:[%s1518_s6 + $0x60] sm:$0xff]  ;;  %v251_v54 = vld [vmem:[%s1518_s6 + $0x58] sm:$0xff] }
  0x1a   :  { %785 = vmatpush3.msra.mxu0 %v55_v23  ;;  %816 = vmatpush3.msra.mxu1 %v151_v24  ;;  %v250_v55 = vld [vmem:[%s1518_s6 + $0x50] sm:$0xff]  ;;  %v249_v56 = vld [vmem:[%s1518_s6 + $0x48] sm:$0xff]  ;;  %v248_v57 = vld [vmem:[%s1518_s6 + $0x40] sm:$0xff] }
  0x1b   :  { %786 = vmatprep.subr.mxu0 %v966_v1  ;;  %817 = vmatprep.subr.mxu1 %v966_v1  ;;  %v247_v58 = vld [vmem:[%s1518_s6 + $0x38] sm:$0xff]  ;;  %v246_v59 = vld [vmem:[%s1518_s6 + $0x30] sm:$0xff]  ;;  %v245_v60 = vld [vmem:[%s1518_s6 + $0x28] sm:$0xff] }
  0x1c   :  { %787 = vmatpush3.msra.mxu0 %v54_v25  ;;  %818 = vmatpush3.msra.mxu1 %v150_v26  ;;  %v669_v61 = vld [vmem:[%s1515_s3] ss:$0 sm:$0xff]  ;;  %v243_v4 = vld [vmem:[%s1518_s6 + $0x18] sm:$0xff]  ;;  %v242_v5 = vld [vmem:[%s1518_s6 + $0x10] sm:$0xff] }
  0x1d   :  { %788 = vmatprep.subr.mxu0 %v966_v1  ;;  %819 = vmatprep.subr.mxu1 %v966_v1  ;;  %v244_v3 = vld [vmem:[%s1518_s6 + $0x20] sm:$0xff]  ;;  %v241_v6 = vld [vmem:[%s1518_s6 + $0x8] sm:$0xff]  ;;  %v378_v8 = vld [vmem:[%s1520_s8 + $0x78] sm:$0xff] }
  0x1e   :  { %789 = vmatpush3.msra.mxu0 %v53_v27  ;;  %820 = vmatpush3.msra.mxu1 %v149_v28  ;;  %v240_v7 = vld [vmem:[%s1518_s6] sm:$0xff]  ;;  %v377_v9 = vld [vmem:[%s1520_s8 + $0x70] sm:$0xff]  ;;  %v376_v15 = vld [vmem:[%s1520_s8 + $0x68] sm:$0xff] }
  0x1f   :  { %790 = vmatprep.subr.mxu0 %v966_v1  ;;  %821 = vmatprep.subr.mxu1 %v966_v1  ;;  %v670_v10 = vld [vmem:[%s1517_s5] ss:$0 sm:$0xff]  ;;  %v374_v17 = vld [vmem:[%s1520_s8 + $0x58] sm:$0xff]  ;;  %v373_v18 = vld [vmem:[%s1520_s8 + $0x50] sm:$0xff] }
  0x20   :  { %791 = vmatpush3.msra.mxu0 %v52_v29  ;;  %822 = vmatpush3.msra.mxu1 %v148_v31  ;;  %v375_v16 = vld [vmem:[%s1520_s8 + $0x60] sm:$0xff]  ;;  %v372_v19 = vld [vmem:[%s1520_s8 + $0x48] sm:$0xff]  ;;  %v370_v21 = vld [vmem:[%s1520_s8 + $0x38] sm:$0xff] }
  0x21   :  { %793 = vmatmul.mubr.f32.vlgmr.msra.gmra.mxu0 %v50_v30  ;;  %823 = vmatprep.subr.mxu1 %v966_v1  ;;  %v371_v20 = vld [vmem:[%s1520_s8 + $0x40] sm:$0xff]  ;;  %v369_v22 = vld [vmem:[%s1520_s8 + $0x30] sm:$0xff]  ;;  %v368_v23 = vld [vmem:[%s1520_s8 + $0x28] sm:$0xff] }
  0x22   :  { %348 = vmatprep.mubr.f32.mxu0 %v966_v1  ;;  %824 = vmatpush3.msra.mxu1 %v147_v32  ;;  %v367_v24 = vld [vmem:[%s1520_s8 + $0x20] sm:$0xff]  ;;  %v366_v25 = vld [vmem:[%s1520_s8 + $0x18] sm:$0xff]  ;;  %v365_v26 = vld [vmem:[%s1520_s8 + $0x10] sm:$0xff] }
  0x23   :  { %825 = vmatprep.subr.mxu1 %v966_v1  ;;  %284 = vmatprep.subr.mxu0 %v271_v34  ;;  %v364_v27 = vld [vmem:[%s1520_s8 + $0x8] sm:$0xff]  ;;  %v363_v28 = vld [vmem:[%s1520_s8] sm:$0xff]  ;;  %v472_v29 = vld [vmem:[%s1522_s10 + $0x78] sm:$0xff] }
  0x24   :  { %826 = vmatpush3.msra.mxu1 %v146_v33  ;;  %285 = vmatpush1.msra.mxu0 %v270_v35  ;;  %v471_v30 = vld [vmem:[%s1522_s10 + $0x70] sm:$0xff]  ;;  %v470_v31 = vld [vmem:[%s1522_s10 + $0x68] sm:$0xff]  ;;  %v469_v32 = vld [vmem:[%s1522_s10 + $0x60] sm:$0xff] }
  0x25   :  { %830 = vmatprep.subr.mxu1 %v966_v1  ;;  %286 = vmatprep.subr.mxu0 %v269_v36  ;;  %v468_v33 = vld [vmem:[%s1522_s10 + $0x58] sm:$0xff]  ;;  %v467_v34 = vld [vmem:[%s1522_s10 + $0x50] sm:$0xff]  ;;  %v466_v35 = vld [vmem:[%s1522_s10 + $0x48] sm:$0xff] }
  0x26   :  { %287 = vmatpush1.msra.mxu0 %v268_v37  ;;  %v465_v36 = vld [vmem:[%s1522_s10 + $0x40] sm:$0xff]  ;;  %v464_v37 = vld [vmem:[%s1522_s10 + $0x38] sm:$0xff] }
  0x27   :  { %288 = vmatprep.subr.mxu0 %v267_v38  ;;  %v463_v38 = vld [vmem:[%s1522_s10 + $0x30] sm:$0xff] }
  0x28   :  { %289 = vmatpush1.msra.mxu0 %v266_v39  ;;  %v462_v39 = vld [vmem:[%s1522_s10 + $0x28] sm:$0xff] }
  0x29   :  { %290 = vmatprep.subr.mxu0 %v265_v40  ;;  %v461_v40 = vld [vmem:[%s1522_s10 + $0x20] sm:$0xff] }
  0x2a   :  { %291 = vmatpush1.msra.mxu0 %v264_v41  ;;  %v460_v41 = vld [vmem:[%s1522_s10 + $0x18] sm:$0xff] }
  0x2b   :  { %292 = vmatprep.subr.mxu0 %v263_v42  ;;  %v274_v42 = vlaneseq }
  0x2c   :  { %293 = vmatpush1.msra.mxu0 %v262_v43 }
  0x2d   :  { %294 = vmatprep.subr.mxu0 %v261_v44  ;;  %v275_v43 = vshrl.u32 %v274_v42, 7 }
  0x2e   :  { %295 = vmatpush1.msra.mxu0 %v260_v45  ;;  %v272_v45 = vld [vmem:[%s1519_s7] sm:$0x3] }
  0x2f   :  { %296 = vmatprep.subr.mxu0 %v259_v46  ;;  %v276_v44 = vsub.s32 0, %v275_v43  ;;  %v280_v46 = vsub.s32 1, %v275_v43 }
  0x30   :  { %297 = vmatpush1.msra.mxu0 %v258_v47 }
  0x31   :  { %298 = vmatprep.subr.mxu0 %v257_v48  ;;  %v277_v47 = vrot.slane %v272_v45, %v276_v44  ;;  %v281_v48 = vrot.slane %v272_v45, %v280_v46 }
  0x32   :  { %299 = vmatpush1.msra.mxu0 %v256_v49 }
  0x33   :  { %300 = vmatprep.subr.mxu0 %v255_v50 }
  0x34   :  { %301 = vmatpush1.msra.mxu0 %v254_v51 }
  0x35   :  { %302 = vmatprep.subr.mxu0 %v253_v52 }
  0x36   :  { %303 = vmatpush1.msra.mxu0 %v252_v53 }
  0x37   :  { %304 = vmatprep.subr.mxu0 %v251_v54 }
  0x38   :  { %305 = vmatpush1.msra.mxu0 %v250_v55  ;;  %v51_v55 = vld [vmem:[%s1513_s1] sm:$0xff] }
  0x39   :  { %306 = vmatprep.subr.mxu0 %v249_v56 }
  0x3a   :  { %307 = vmatpush1.msra.mxu0 %v248_v57 }
  0x3b   :  { %308 = vmatprep.subr.mxu0 %v247_v58 }
  0x3c   :  { %309 = vmatpush1.msra.mxu0 %v246_v59  ;;  %v459_v59 = vld [vmem:[%s1522_s10 + $0x10] sm:$0xff] }
  0x3d   :  { %310 = vmatprep.subr.mxu0 %v245_v60  ;;  %v458_v60 = vld [vmem:[%s1522_s10 + $0x8] sm:$0xff] }
  0x3e   :  { %311 = vmatpush1.msra.mxu0 %v244_v3  ;;  %v562_v3 = vld [vmem:[%s1524_s12 + $0x58] sm:$0xff] }
  0x3f   :  { %312 = vmatprep.subr.mxu0 %v243_v4  ;;  %v561_v4 = vld [vmem:[%s1524_s12 + $0x50] sm:$0xff] }
  0x40   :  { %313 = vmatpush1.msra.mxu0 %v242_v5  ;;  %v560_v5 = vld [vmem:[%s1524_s12 + $0x48] sm:$0xff] }
  0x41   :  { %314 = vmatprep.subr.mxu0 %v241_v6  ;;  %v559_v6 = vld [vmem:[%s1524_s12 + $0x40] sm:$0xff] }
  0x42   :  { %315 = vmatpush1.msra.mxu0 %v240_v7  ;;  %v558_v7 = vld [vmem:[%s1524_s12 + $0x38] sm:$0xff] }
  0x43   :  { %865 = vmatprep.subr.mxu0 %v966_v1 }
  0xe1   :  { %v141_v62 = vpop.f32.mrf.mxu0 }
  0xe2   :  { %v142_v63 = vadd.f32 %v669_v61, %v141_v62  ;;  %v457_v61 = vld [vmem:[%s1522_s10] sm:$0xff]  ;;  %v566_v62 = vld [vmem:[%s1524_s12 + $0x78] sm:$0xff] }
  0xe3   :  { %v794_v0 = vpop.f32.mrf.mxu0 }
  0xe4   :  { %v145_v2 = vmax.f32 %v142_v63, 0.0  ;;  %v565_v63 = vld [vmem:[%s1524_s12 + $0x70] sm:$0xff]  ;;  %v564_v0 = vld [vmem:[%s1524_s12 + $0x68] sm:$0xff] }
  0xe6   :  { %828 = vmatmul.mubr.f32.vlgmr.msra.gmra.mxu1 %v145_v2  ;;  %v563_v2 = vld [vmem:[%s1524_s12 + $0x60] sm:$0xff] }
  0xe7   :  { %862 = vmatprep.mubr.msk.f32.mxu1 %vm967_vm0, %v966_v1  ;;  %831 = vmatpush3.msra.mxu1 %v378_v8  ;;  %v557_v8 = vld [vmem:[%s1524_s12 + $0x30] sm:$0xff] }
  0xe8   :  { %832 = vmatprep.subr.mxu1 %v966_v1 }
  0xe9   :  { %833 = vmatpush3.msra.mxu1 %v377_v9  ;;  %v556_v9 = vld [vmem:[%s1524_s12 + $0x28] sm:$0xff] }
  0xea   :  { %834 = vmatprep.subr.mxu1 %v966_v1 }
  0xeb   :  { %835 = vmatpush3.msra.mxu1 %v376_v15 }
  0xec   :  { %836 = vmatprep.subr.mxu1 %v966_v1 }
  0xed   :  { %837 = vmatpush3.msra.mxu1 %v375_v16 }
  0xee   :  { %838 = vmatprep.subr.mxu1 %v966_v1 }
  0xef   :  { %839 = vmatpush3.msra.mxu1 %v374_v17  ;;  %v553_v17 = vld [vmem:[%s1524_s12 + $0x10] sm:$0xff] }
  0xf0   :  { %840 = vmatprep.subr.mxu1 %v966_v1 }
  0xf1   :  { %841 = vmatpush3.msra.mxu1 %v373_v18  ;;  %v552_v18 = vld [vmem:[%s1524_s12 + $0x8] sm:$0xff] }
  0xf2   :  { %842 = vmatprep.subr.mxu1 %v966_v1 }
  0xf3   :  { %843 = vmatpush3.msra.mxu1 %v372_v19  ;;  %v551_v19 = vld [vmem:[%s1524_s12] sm:$0xff] }
  0xf4   :  { %844 = vmatprep.subr.mxu1 %v966_v1 }
  0xf5   :  { %845 = vmatpush3.msra.mxu1 %v371_v20  ;;  %v672_v20 = vld [vmem:[%s1523_s11] ss:$0 sm:$0xff] }
  0xf6   :  { %846 = vmatprep.subr.mxu1 %v966_v1 }
  0xf7   :  { %847 = vmatpush3.msra.mxu1 %v370_v21 }
  0xf8   :  { %848 = vmatprep.subr.mxu1 %v966_v1 }
  0xf9   :  { %849 = vmatpush3.msra.mxu1 %v369_v22 }
  0xfa   :  { %850 = vmatprep.subr.mxu1 %v966_v1 }
  0xfb   :  { %851 = vmatpush3.msra.mxu1 %v368_v23 }
  0xfc   :  { %852 = vmatprep.subr.mxu1 %v966_v1 }
  0xfd   :  { %853 = vmatpush3.msra.mxu1 %v367_v24 }
  0xfe   :  { %854 = vmatprep.subr.mxu1 %v966_v1 }
  0xff   :  { %855 = vmatpush3.msra.mxu1 %v366_v25  ;;  %v673_v25 = vld [vmem:[%s1525_s13] ss:$0 sm:$0xff] }
 0x100   :  { %856 = vmatprep.subr.mxu1 %v966_v1 }
 0x101   :  { %857 = vmatpush3.msra.mxu1 %v365_v26 }
 0x102   :  { %858 = vmatprep.subr.mxu1 %v966_v1 }
 0x103   :  { %859 = vmatpush3.msra.mxu1 %v364_v27 }
 0x104   :  { %860 = vmatprep.subr.mxu1 %v966_v1 }
 0x105   :  { %861 = vmatpush3.msra.mxu1 %v363_v28 }
 0x106   :  { %900 = vmatprep.subr.mxu1 %v966_v1 }
 0x1a6   :  { %v235_v11 = vpop.f32.mrf.mxu1 }
 0x1a7   :  { %v236_v12 = vadd.f32 %v670_v10, %v235_v11  ;;  %v555_v10 = vld [vmem:[%s1524_s12 + $0x20] sm:$0xff]  ;;  %v554_v11 = vld [vmem:[%s1524_s12 + $0x18] sm:$0xff]  ;;  %s968_s12 = smov [#allocation2]  }
 0x1a8   :  { %v829_v13 = vpop.f32.mrf.mxu1  ;;  %s657_s4 = sshll.u32 %s968_s12, 4  ;;  %s658_s4 = int_to_ptr.vmem [resolvable:$true] %s657_s4 }
 0x1a9   :  { %v239_v14 = vmax.f32 %v236_v12, 0.0  ;;  %v671_v12 = vld [vmem:[%s1521_s9] ss:$0 sm:$0xff]  ;;  %s944_s11 = scalar_lea.vmem %s658_s4, 128  ;;  %p949_p1 = scmp.lt.s32.totalorder %s658_s4, %s658_s4 }
 0x1aa   :  { %p945_p0 = scmp.ne.s32.totalorder %s658_s4, %s944_s11  ;;  %p950_p2 = scmp.lt.s32.totalorder %s944_s11, %s944_s11 }
 0x1ab   :  { %349 = vmatmul.mubr.f32.vlgmr.msra.gmra.mxu0 %v239_v14 }
 0x1ac   :  { %897 = vmatprep.mubr.msk.f32.mxu0 %vm967_vm0, %v966_v1  ;;  %866 = vmatpush3.msra.mxu0 %v472_v29  ;;  %p951_p3 = por %p950_p2, %p949_p1 }
 0x1ad   :  { %867 = vmatprep.subr.mxu0 %v966_v1 }
 0x1ae   :  { %868 = vmatpush3.msra.mxu0 %v471_v30  ;;  %p952_p4 = pnand %p951_p3, %p945_p0 }
 0x1af   :  { %869 = vmatprep.subr.mxu0 %v966_v1 }
 0x1b0   :  { %870 = vmatpush3.msra.mxu0 %v470_v31 }
 0x1b1   :  { %871 = vmatprep.subr.mxu0 %v966_v1 }
 0x1b2   :  { %872 = vmatpush3.msra.mxu0 %v469_v32 }
 0x1b3   :  { %873 = vmatprep.subr.mxu0 %v966_v1 }
 0x1b4   :  { %874 = vmatpush3.msra.mxu0 %v468_v33 }
 0x1b5   :  { %875 = vmatprep.subr.mxu0 %v966_v1 }
 0x1b6   :  { %876 = vmatpush3.msra.mxu0 %v467_v34 }
 0x1b7   :  { %877 = vmatprep.subr.mxu0 %v966_v1 }
 0x1b8   :  { %878 = vmatpush3.msra.mxu0 %v466_v35 }
 0x1b9   :  { %879 = vmatprep.subr.mxu0 %v966_v1 }
 0x1ba   :  { %880 = vmatpush3.msra.mxu0 %v465_v36 }
 0x1bb   :  { %881 = vmatprep.subr.mxu0 %v966_v1 }
 0x1bc   :  { %882 = vmatpush3.msra.mxu0 %v464_v37 }
 0x1bd   :  { %883 = vmatprep.subr.mxu0 %v966_v1 }
 0x1be   :  { %884 = vmatpush3.msra.mxu0 %v463_v38 }
 0x1bf   :  { %885 = vmatprep.subr.mxu0 %v966_v1 }
 0x1c0   :  { %886 = vmatpush3.msra.mxu0 %v462_v39 }
 0x1c1   :  { %887 = vmatprep.subr.mxu0 %v966_v1 }
 0x1c2   :  { %888 = vmatpush3.msra.mxu0 %v461_v40 }
 0x1c3   :  { %889 = vmatprep.subr.mxu0 %v966_v1 }
 0x1c4   :  { %890 = vmatpush3.msra.mxu0 %v460_v41 }
 0x1c5   :  { %891 = vmatprep.subr.mxu0 %v966_v1 }
 0x1c6   :  { %892 = vmatpush3.msra.mxu0 %v459_v59 }
 0x1c7   :  { %893 = vmatprep.subr.mxu0 %v966_v1 }
 0x1c8   :  { %894 = vmatpush3.msra.mxu0 %v458_v60 }
 0x1c9   :  { %895 = vmatprep.subr.mxu0 %v966_v1 }
 0x1ca   :  { %896 = vmatpush3.msra.mxu0 %v457_v61 }
 0x26b   :  { %v350_v49 = vpop.f32.mrf.mxu0 }
 0x26c   :  { %v351_v50 = vadd.f32 %v350_v49, %v277_v47 }
 0x26d   :  { %v352_v51 = vpop.f32.mrf.mxu0 }
 0x26e   :  { %360 = vst [vmem:[%s1527_s15] sm:$0xff] %v351_v50  ;;  %v353_v52 = vadd.f32 %v352_v51, %v281_v48 }
 0x270   :  { %v355_v53 = vmul.f32 0.5, %v353_v52  ;;  %361 = vst [vmem:[%s1527_s15 + $0x8] sm:$0xff] %v353_v52 }
 0x272   :  { %v356_v54 = vmul.f32 1.442695, %v355_v53 }
 0x274   :  { %938 = vpow2.f32 %v356_v54 }
 0x281   :  { %v939_v56 = vpop.eup %938 }
 0x282   :  { %v358_v57 = vmul.f32 %v939_v56, %v51_v55 }
 0x284   :  { %v359_v58 = vadd.f32 %v358_v57, %v351_v50 }
 0x286   :  { %362 = vst [vmem:[%s1527_s15 + $0x10] sm:$0xff] %v359_v58  ;;  %863 = vmatmul.mubr.f32.vlgmr.msra.gmra.mxu1 %v359_v58 }
 0x287   :  { %932 = vmatprep.mubr.msk.f32.mxu1 %vm967_vm0, %v966_v1  ;;  %901 = vmatpush3.msra.mxu1 %v566_v62 }
 0x288   :  { %902 = vmatprep.subr.mxu1 %v966_v1 }
 0x289   :  { %903 = vmatpush3.msra.mxu1 %v565_v63 }
 0x28a   :  { %904 = vmatprep.subr.mxu1 %v966_v1 }
 0x28b   :  { %905 = vmatpush3.msra.mxu1 %v564_v0 }
 0x28c   :  { %906 = vmatprep.subr.mxu1 %v966_v1 }
 0x28d   :  { %907 = vmatpush3.msra.mxu1 %v563_v2 }
 0x28e   :  { %908 = vmatprep.subr.mxu1 %v966_v1 }
 0x28f   :  { %909 = vmatpush3.msra.mxu1 %v562_v3 }
 0x290   :  { %910 = vmatprep.subr.mxu1 %v966_v1 }
 0x291   :  { %911 = vmatpush3.msra.mxu1 %v561_v4 }
 0x292   :  { %912 = vmatprep.subr.mxu1 %v966_v1 }
 0x293   :  { %913 = vmatpush3.msra.mxu1 %v560_v5 }
 0x294   :  { %914 = vmatprep.subr.mxu1 %v966_v1 }
 0x295   :  { %915 = vmatpush3.msra.mxu1 %v559_v6 }
 0x296   :  { %916 = vmatprep.subr.mxu1 %v966_v1 }
 0x297   :  { %917 = vmatpush3.msra.mxu1 %v558_v7 }
 0x298   :  { %918 = vmatprep.subr.mxu1 %v966_v1 }
 0x299   :  { %919 = vmatpush3.msra.mxu1 %v557_v8 }
 0x29a   :  { %920 = vmatprep.subr.mxu1 %v966_v1 }
 0x29b   :  { %921 = vmatpush3.msra.mxu1 %v556_v9 }
 0x29c   :  { %922 = vmatprep.subr.mxu1 %v966_v1 }
 0x29d   :  { %923 = vmatpush3.msra.mxu1 %v555_v10 }
 0x29e   :  { %924 = vmatprep.subr.mxu1 %v966_v1 }
 0x29f   :  { %925 = vmatpush3.msra.mxu1 %v554_v11 }
 0x2a0   :  { %926 = vmatprep.subr.mxu1 %v966_v1 }
 0x2a1   :  { %927 = vmatpush3.msra.mxu1 %v553_v17 }
 0x2a2   :  { %928 = vmatprep.subr.mxu1 %v966_v1 }
 0x2a3   :  { %929 = vmatpush3.msra.mxu1 %v552_v18 }
 0x2a4   :  { %930 = vmatprep.subr.mxu1 %v966_v1 }
 0x2a5   :  { %931 = vmatpush3.msra.mxu1 %v551_v19 }
 0x346   :  { %v452_v13 = vpop.f32.mrf.mxu1 }
 0x347   :  { %v453_v14 = vadd.f32 %v671_v12, %v452_v13 }
 0x348   :  { %v864_v15 = vpop.f32.mrf.mxu1 }
 0x349   :  { %v456_v16 = vmax.f32 %v453_v14, 0.0 }
 0x34b   :  { %898 = vmatmul.mubr.f32.vlgmr.msra.gmra.mxu0 %v456_v16 }
 0x40b   :  { %v546_v21 = vpop.f32.mrf.mxu0 }
 0x40c   :  { %v547_v22 = vadd.f32 %v672_v20, %v546_v21 }
 0x40d   :  { %v899_v23 = vpop.f32.mrf.mxu0 }
 0x40e   :  { %v550_v24 = vmax.f32 %v547_v22, 0.0 }
 0x410   :  { %933 = vmatmul.mubr.f32.vlgmr.msra.gmra.mxu1 %v550_v24 }
 0x4d0   :  { %v640_v26 = vpop.f32.mrf.mxu1 }
 0x4d1   :  { %v641_v1 = vadd.f32 %v673_v25, %v640_v26 }
 0x4d2   :  { %v934_v27 = vpop.f32.mrf.mxu1 }
 0x4d3   :  { %v674_v28 = vmul.f32 -1.442695, %v641_v1 }
 0x4d5   :  { %940 = vpow2.f32 %v674_v28 }
 0x4e2   :  { %v941_v29 = vpop.eup %940 }
 0x4e3   :  { %v647_v30 = vadd.f32 1.0, %v941_v29 }
 0x4e5   :  { %942 = vrcp.f32 %v647_v30 }
 0x4f2   :  { %v943_v31 = vpop.eup %942 }
 0x4f3   :  { %650 = vst [vmem:[#allocation2] sm:$0xff] %v943_v31 }
 0x4f4   :  { %955 = shalt.err (!%p952_p4)
}
 0x4f5   :  { %660 = dma.vmem_to_hbm [thread:$0]  %s658_s4, 128, %s1526_s14, [#allocation3]  }
 0x4f6   :  { %964 = dma.done.wait [#allocation3], 128  }
 0x4f7   :  { %965 = vsyncadd [#allocation3], 4294967168 }
 0x4f8   :  { %668 = vsyncpa [#allocation3], 1 }

// kernel: vae_forward.1
= control target key start
LH: loop header
LB: loop body
LE: loop exit
PB: predicated region body
PF: predicated region fallthrough
CT: control target
= control target key end

     0   :  { %v966_v1 = vmov 0.0   ;;  %vm967_vm0 = vmmov 0   ;;  %s1512_s0 = inlined_call_operand.vmem [shape: f32[8,128], index: 0, kind: input, shape index: {}]   ;;  %s1513_s1 = inlined_call_operand.vmem [shape: f32[8,128], index: 1, kind: input, shape index: {}]   ;;  %s1514_s2 = inlined_call_operand.vmem [shape: f32[128,128], index: 2, kind: input, shape index: {}]   ;;  %s1515_s3 = inlined_call_operand.vmem [shape: f32[1,128], index: 3, kind: input, shape index: {}]   ;;  %s1516_s4 = inlined_call_operand.vmem [shape: f32[128,128], index: 4, kind: input, shape index: {}]   ;;  %s1517_s5 = inlined_call_operand.vmem [shape: f32[1,128], index: 5, kind: input, shape index: {}]   ;;  %s1518_s6 = inlined_call_operand.vmem [shape: f32[128,256], index: 6, kind: input, shape index: {}]   ;;  %s1519_s7 = inlined_call_operand.vmem [shape: f32[1,256], index: 7, kind: input, shape index: {}]   ;;  %s1520_s8 = inlined_call_operand.vmem [shape: f32[128,128], index: 8, kind: input, shape index: {}]   ;;  %s1521_s9 = inlined_call_operand.vmem [shape: f32[1,128], index: 9, kind: input, shape index: {}]   ;;  %s1522_s10 = inlined_call_operand.vmem [shape: f32[128,128], index: 10, kind: input, shape index: {}]   ;;  %s1523_s11 = inlined_call_operand.vmem [shape: f32[1,128], index: 11, kind: input, shape index: {}]   ;;  %s1524_s12 = inlined_call_operand.vmem [shape: f32[128,128], index: 12, kind: input, shape index: {}]   ;;  %s1525_s13 = inlined_call_operand.vmem [shape: f32[1,128], index: 13, kind: input, shape index: {}]   ;;  %s1526_s14 = inlined_call_operand.hbm [shape: f32[8,128], index: 14, kind: output, shape index: {0}]   ;;  %s1527_s15 = inlined_call_operand.vmem [shape: f32[8,384], index: 15, kind: output, shape index: {1}]  }
   0x1   :  { %v67_v0 = vld [vmem:[%s1514_s2 + $0x78] sm:$0xff]  ;;  %760 = vmatprep.subr.mxu0 %v966_v1  ;;  %v66_v2 = vld [vmem:[%s1514_s2 + $0x70] sm:$0xff]  ;;  %792 = vmatprep.mubr.msk.f32.mxu0 %vm967_vm0, %v966_v1  ;;  %v65_v3 = vld [vmem:[%s1514_s2 + $0x68] sm:$0xff] }
   0x2   :  { %761 = vmatpush3.msra.mxu0 %v67_v0  ;;  %795 = vmatprep.subr.mxu1 %v966_v1  ;;  %v64_v4 = vld [vmem:[%s1514_s2 + $0x60] sm:$0xff]  ;;  %v161_v5 = vld [vmem:[%s1516_s4 + $0x78] sm:$0xff]  ;;  %v160_v6 = vld [vmem:[%s1516_s4 + $0x70] sm:$0xff] }
   0x3   :  { %762 = vmatprep.subr.mxu0 %v966_v1  ;;  %827 = vmatprep.mubr.msk.f32.mxu1 %vm967_vm0, %v966_v1  ;;  %v63_v7 = vld [vmem:[%s1514_s2 + $0x58] sm:$0xff]  ;;  %v159_v8 = vld [vmem:[%s1516_s4 + $0x68] sm:$0xff]  ;;  %v62_v9 = vld [vmem:[%s1514_s2 + $0x50] sm:$0xff] }
   0x4   :  { %763 = vmatpush3.msra.mxu0 %v66_v2  ;;  %796 = vmatpush3.msra.mxu1 %v161_v5  ;;  %v158_v10 = vld [vmem:[%s1516_s4 + $0x60] sm:$0xff] }
   0x5   :  { %764 = vmatprep.subr.mxu0 %v966_v1  ;;  %797 = vmatprep.subr.mxu1 %v966_v1 }
   0x6   :  { %765 = vmatpush3.msra.mxu0 %v65_v3  ;;  %798 = vmatpush3.msra.mxu1 %v160_v6 }
   0x7   :  { %766 = vmatprep.subr.mxu0 %v966_v1  ;;  %799 = vmatprep.subr.mxu1 %v966_v1 }
   0x8   :  { %767 = vmatpush3.msra.mxu0 %v64_v4  ;;  %800 = vmatpush3.msra.mxu1 %v159_v8 }
   0x9   :  { %768 = vmatprep.subr.mxu0 %v966_v1 }
   0xa   :  { %769 = vmatpush3.msra.mxu0 %v63_v7 }
   0xb   :  { %21 = vsyncpa [#allocation3], 0  ;;  %770 = vmatprep.subr.mxu0 %v966_v1  ;;  %v61_v11 = vld [vmem:[%s1514_s2 + $0x48] sm:$0xff]  ;;  %801 = vmatprep.subr.mxu1 %v966_v1  ;;  %v157_v12 = vld [vmem:[%s1516_s4 + $0x58] sm:$0xff] }
   0xc   :  { %771 = vmatpush3.msra.mxu0 %v62_v9  ;;  %802 = vmatpush3.msra.mxu1 %v158_v10  ;;  %v60_v13 = vld [vmem:[%s1514_s2 + $0x40] sm:$0xff]  ;;  %v156_v14 = vld [vmem:[%s1516_s4 + $0x50] sm:$0xff]  ;;  %v59_v15 = vld [vmem:[%s1514_s2 + $0x38] sm:$0xff] }
   0xd   :  { %772 = vmatprep.subr.mxu0 %v966_v1  ;;  %803 = vmatprep.subr.mxu1 %v966_v1  ;;  %v155_v16 = vld [vmem:[%s1516_s4 + $0x48] sm:$0xff]  ;;  %v58_v17 = vld [vmem:[%s1514_s2 + $0x30] sm:$0xff]  ;;  %v154_v18 = vld [vmem:[%s1516_s4 + $0x40] sm:$0xff] }
   0xe   :  { %773 = vmatpush3.msra.mxu0 %v61_v11  ;;  %804 = vmatpush3.msra.mxu1 %v157_v12  ;;  %v57_v19 = vld [vmem:[%s1514_s2 + $0x28] sm:$0xff]  ;;  %v153_v20 = vld [vmem:[%s1516_s4 + $0x38] sm:$0xff]  ;;  %v56_v21 = vld [vmem:[%s1514_s2 + $0x20] sm:$0xff] }
   0xf   :  { %774 = vmatprep.subr.mxu0 %v966_v1  ;;  %805 = vmatprep.subr.mxu1 %v966_v1  ;;  %v152_v22 = vld [vmem:[%s1516_s4 + $0x30] sm:$0xff]  ;;  %v55_v23 = vld [vmem:[%s1514_s2 + $0x18] sm:$0xff]  ;;  %v151_v24 = vld [vmem:[%s1516_s4 + $0x28] sm:$0xff] }
  0x10   :  { %775 = vmatpush3.msra.mxu0 %v60_v13  ;;  %806 = vmatpush3.msra.mxu1 %v156_v14  ;;  %v54_v25 = vld [vmem:[%s1514_s2 + $0x10] sm:$0xff]  ;;  %v150_v26 = vld [vmem:[%s1516_s4 + $0x20] sm:$0xff]  ;;  %v53_v27 = vld [vmem:[%s1514_s2 + $0x8] sm:$0xff] }
  0x11   :  { %776 = vmatprep.subr.mxu0 %v966_v1  ;;  %807 = vmatprep.subr.mxu1 %v966_v1  ;;  %v149_v28 = vld [vmem:[%s1516_s4 + $0x18] sm:$0xff]  ;;  %v52_v29 = vld [vmem:[%s1514_s2] sm:$0xff]  ;;  %v148_v31 = vld [vmem:[%s1516_s4 + $0x10] sm:$0xff] }
  0x12   :  { %777 = vmatpush3.msra.mxu0 %v59_v15  ;;  %808 = vmatpush3.msra.mxu1 %v155_v16  ;;  %v50_v30 = vld [vmem:[%s1512_s0] sm:$0xff]  ;;  %v147_v32 = vld [vmem:[%s1516_s4 + $0x8] sm:$0xff]  ;;  %v271_v34 = vld [vmem:[%s1518_s6 + $0xf8] sm:$0xff] }
  0x13   :  { %778 = vmatprep.subr.mxu0 %v966_v1  ;;  %809 = vmatprep.subr.mxu1 %v966_v1  ;;  %v146_v33 = vld [vmem:[%s1516_s4] sm:$0xff]  ;;  %v270_v35 = vld [vmem:[%s1518_s6 + $0xf0] sm:$0xff]  ;;  %v269_v36 = vld [vmem:[%s1518_s6 + $0xe8] sm:$0xff] }
  0x14   :  { %779 = vmatpush3.msra.mxu0 %v58_v17  ;;  %810 = vmatpush3.msra.mxu1 %v154_v18  ;;  %v268_v37 = vld [vmem:[%s1518_s6 + $0xe0] sm:$0xff]  ;;  %v267_v38 = vld [vmem:[%s1518_s6 + $0xd8] sm:$0xff]  ;;  %v266_v39 = vld [vmem:[%s1518_s6 + $0xd0] sm:$0xff] }
  0x15   :  { %780 = vmatprep.subr.mxu0 %v966_v1  ;;  %811 = vmatprep.subr.mxu1 %v966_v1  ;;  %v265_v40 = vld [vmem:[%s1518_s6 + $0xc8] sm:$0xff]  ;;  %v264_v41 = vld [vmem:[%s1518_s6 + $0xc0] sm:$0xff]  ;;  %v263_v42 = vld [vmem:[%s1518_s6 + $0xb8] sm:$0xff] }
  0x16   :  { %781 = vmatpush3.msra.mxu0 %v57_v19  ;;  %812 = vmatpush3.msra.mxu1 %v153_v20  ;;  %v262_v43 = vld [vmem:[%s1518_s6 + $0xb0] sm:$0xff]  ;;  %v261_v44 = vld [vmem:[%s1518_s6 + $0xa8] sm:$0xff]  ;;  %v260_v45 = vld [vmem:[%s1518_s6 + $0xa0] sm:$0xff] }
  0x17   :  { %782 = vmatprep.subr.mxu0 %v966_v1  ;;  %813 = vmatprep.subr.mxu1 %v966_v1  ;;  %v259_v46 = vld [vmem:[%s1518_s6 + $0x98] sm:$0xff]  ;;  %v258_v47 = vld [vmem:[%s1518_s6 + $0x90] sm:$0xff]  ;;  %v257_v48 = vld [vmem:[%s1518_s6 + $0x88] sm:$0xff] }
  0x18   :  { %783 = vmatpush3.msra.mxu0 %v56_v21  ;;  %814 = vmatpush3.msra.mxu1 %v152_v22  ;;  %v256_v49 = vld [vmem:[%s1518_s6 + $0x80] sm:$0xff]  ;;  %v255_v50 = vld [vmem:[%s1518_s6 + $0x78] sm:$0xff]  ;;  %v254_v51 = vld [vmem:[%s1518_s6 + $0x70] sm:$0xff] }
  0x19   :  { %784 = vmatprep.subr.mxu0 %v966_v1  ;;  %815 = vmatprep.subr.mxu1 %v966_v1  ;;  %v253_v52 = vld [vmem:[%s1518_s6 + $0x68] sm:$0xff]  ;;  %v252_v53 = vld [vmem:[%s1518_s6 + $0x60] sm:$0xff]  ;;  %v251_v54 = vld [vmem:[%s1518_s6 + $0x58] sm:$0xff] }
  0x1a   :  { %785 = vmatpush3.msra.mxu0 %v55_v23  ;;  %816 = vmatpush3.msra.mxu1 %v151_v24  ;;  %v250_v55 = vld [vmem:[%s1518_s6 + $0x50] sm:$0xff]  ;;  %v249_v56 = vld [vmem:[%s1518_s6 + $0x48] sm:$0xff]  ;;  %v248_v57 = vld [vmem:[%s1518_s6 + $0x40] sm:$0xff] }
  0x1b   :  { %786 = vmatprep.subr.mxu0 %v966_v1  ;;  %817 = vmatprep.subr.mxu1 %v966_v1  ;;  %v247_v58 = vld [vmem:[%s1518_s6 + $0x38] sm:$0xff]  ;;  %v246_v59 = vld [vmem:[%s1518_s6 + $0x30] sm:$0xff]  ;;  %v245_v60 = vld [vmem:[%s1518_s6 + $0x28] sm:$0xff] }
  0x1c   :  { %787 = vmatpush3.msra.mxu0 %v54_v25  ;;  %818 = vmatpush3.msra.mxu1 %v150_v26  ;;  %v669_v61 = vld [vmem:[%s1515_s3] ss:$0 sm:$0xff]  ;;  %v243_v4 = vld [vmem:[%s1518_s6 + $0x18] sm:$0xff]  ;;  %v242_v5 = vld [vmem:[%s1518_s6 + $0x10] sm:$0xff] }
  0x1d   :  { %788 = vmatprep.subr.mxu0 %v966_v1  ;;  %819 = vmatprep.subr.mxu1 %v966_v1  ;;  %v244_v3 = vld [vmem:[%s1518_s6 + $0x20] sm:$0xff]  ;;  %v241_v6 = vld [vmem:[%s1518_s6 + $0x8] sm:$0xff]  ;;  %v378_v8 = vld [vmem:[%s1520_s8 + $0x78] sm:$0xff] }
  0x1e   :  { %789 = vmatpush3.msra.mxu0 %v53_v27  ;;  %820 = vmatpush3.msra.mxu1 %v149_v28  ;;  %v240_v7 = vld [vmem:[%s1518_s6] sm:$0xff]  ;;  %v377_v9 = vld [vmem:[%s1520_s8 + $0x70] sm:$0xff]  ;;  %v376_v15 = vld [vmem:[%s1520_s8 + $0x68] sm:$0xff] }
  0x1f   :  { %790 = vmatprep.subr.mxu0 %v966_v1  ;;  %821 = vmatprep.subr.mxu1 %v966_v1  ;;  %v670_v10 = vld [vmem:[%s1517_s5] ss:$0 sm:$0xff]  ;;  %v374_v17 = vld [vmem:[%s1520_s8 + $0x58] sm:$0xff]  ;;  %v373_v18 = vld [vmem:[%s1520_s8 + $0x50] sm:$0xff] }
  0x20   :  { %791 = vmatpush3.msra.mxu0 %v52_v29  ;;  %822 = vmatpush3.msra.mxu1 %v148_v31  ;;  %v375_v16 = vld [vmem:[%s1520_s8 + $0x60] sm:$0xff]  ;;  %v372_v19 = vld [vmem:[%s1520_s8 + $0x48] sm:$0xff]  ;;  %v370_v21 = vld [vmem:[%s1520_s8 + $0x38] sm:$0xff] }
  0x21   :  { %793 = vmatmul.mubr.f32.vlgmr.msra.gmra.mxu0 %v50_v30  ;;  %823 = vmatprep.subr.mxu1 %v966_v1  ;;  %v371_v20 = vld [vmem:[%s1520_s8 + $0x40] sm:$0xff]  ;;  %v369_v22 = vld [vmem:[%s1520_s8 + $0x30] sm:$0xff]  ;;  %v368_v23 = vld [vmem:[%s1520_s8 + $0x28] sm:$0xff] }
  0x22   :  { %348 = vmatprep.mubr.f32.mxu0 %v966_v1  ;;  %824 = vmatpush3.msra.mxu1 %v147_v32  ;;  %v367_v24 = vld [vmem:[%s1520_s8 + $0x20] sm:$0xff]  ;;  %v366_v25 = vld [vmem:[%s1520_s8 + $0x18] sm:$0xff]  ;;  %v365_v26 = vld [vmem:[%s1520_s8 + $0x10] sm:$0xff] }
  0x23   :  { %825 = vmatprep.subr.mxu1 %v966_v1  ;;  %284 = vmatprep.subr.mxu0 %v271_v34  ;;  %v364_v27 = vld [vmem:[%s1520_s8 + $0x8] sm:$0xff]  ;;  %v363_v28 = vld [vmem:[%s1520_s8] sm:$0xff]  ;;  %v472_v29 = vld [vmem:[%s1522_s10 + $0x78] sm:$0xff] }
  0x24   :  { %826 = vmatpush3.msra.mxu1 %v146_v33  ;;  %285 = vmatpush1.msra.mxu0 %v270_v35  ;;  %v471_v30 = vld [vmem:[%s1522_s10 + $0x70] sm:$0xff]  ;;  %v470_v31 = vld [vmem:[%s1522_s10 + $0x68] sm:$0xff]  ;;  %v469_v32 = vld [vmem:[%s1522_s10 + $0x60] sm:$0xff] }
  0x25   :  { %830 = vmatprep.subr.mxu1 %v966_v1  ;;  %286 = vmatprep.subr.mxu0 %v269_v36  ;;  %v468_v33 = vld [vmem:[%s1522_s10 + $0x58] sm:$0xff]  ;;  %v467_v34 = vld [vmem:[%s1522_s10 + $0x50] sm:$0xff]  ;;  %v466_v35 = vld [vmem:[%s1522_s10 + $0x48] sm:$0xff] }
  0x26   :  { %287 = vmatpush1.msra.mxu0 %v268_v37  ;;  %v465_v36 = vld [vmem:[%s1522_s10 + $0x40] sm:$0xff]  ;;  %v464_v37 = vld [vmem:[%s1522_s10 + $0x38] sm:$0xff] }
  0x27   :  { %288 = vmatprep.subr.mxu0 %v267_v38  ;;  %v463_v38 = vld [vmem:[%s1522_s10 + $0x30] sm:$0xff] }
  0x28   :  { %289 = vmatpush1.msra.mxu0 %v266_v39  ;;  %v462_v39 = vld [vmem:[%s1522_s10 + $0x28] sm:$0xff] }
  0x29   :  { %290 = vmatprep.subr.mxu0 %v265_v40  ;;  %v461_v40 = vld [vmem:[%s1522_s10 + $0x20] sm:$0xff] }
  0x2a   :  { %291 = vmatpush1.msra.mxu0 %v264_v41  ;;  %v460_v41 = vld [vmem:[%s1522_s10 + $0x18] sm:$0xff] }
  0x2b   :  { %292 = vmatprep.subr.mxu0 %v263_v42  ;;  %v274_v42 = vlaneseq }
  0x2c   :  { %293 = vmatpush1.msra.mxu0 %v262_v43 }
  0x2d   :  { %294 = vmatprep.subr.mxu0 %v261_v44  ;;  %v275_v43 = vshrl.u32 %v274_v42, 7 }
  0x2e   :  { %295 = vmatpush1.msra.mxu0 %v260_v45  ;;  %v272_v45 = vld [vmem:[%s1519_s7] sm:$0x3] }
  0x2f   :  { %296 = vmatprep.subr.mxu0 %v259_v46  ;;  %v276_v44 = vsub.s32 0, %v275_v43  ;;  %v280_v46 = vsub.s32 1, %v275_v43 }
  0x30   :  { %297 = vmatpush1.msra.mxu0 %v258_v47 }
  0x31   :  { %298 = vmatprep.subr.mxu0 %v257_v48  ;;  %v277_v47 = vrot.slane %v272_v45, %v276_v44  ;;  %v281_v48 = vrot.slane %v272_v45, %v280_v46 }
  0x32   :  { %299 = vmatpush1.msra.mxu0 %v256_v49 }
  0x33   :  { %300 = vmatprep.subr.mxu0 %v255_v50 }
  0x34   :  { %301 = vmatpush1.msra.mxu0 %v254_v51 }
  0x35   :  { %302 = vmatprep.subr.mxu0 %v253_v52 }
  0x36   :  { %303 = vmatpush1.msra.mxu0 %v252_v53 }
  0x37   :  { %304 = vmatprep.subr.mxu0 %v251_v54 }
  0x38   :  { %305 = vmatpush1.msra.mxu0 %v250_v55  ;;  %v51_v55 = vld [vmem:[%s1513_s1] sm:$0xff] }
  0x39   :  { %306 = vmatprep.subr.mxu0 %v249_v56 }
  0x3a   :  { %307 = vmatpush1.msra.mxu0 %v248_v57 }
  0x3b   :  { %308 = vmatprep.subr.mxu0 %v247_v58 }
  0x3c   :  { %309 = vmatpush1.msra.mxu0 %v246_v59  ;;  %v459_v59 = vld [vmem:[%s1522_s10 + $0x10] sm:$0xff] }
  0x3d   :  { %310 = vmatprep.subr.mxu0 %v245_v60  ;;  %v458_v60 = vld [vmem:[%s1522_s10 + $0x8] sm:$0xff] }
  0x3e   :  { %311 = vmatpush1.msra.mxu0 %v244_v3  ;;  %v562_v3 = vld [vmem:[%s1524_s12 + $0x58] sm:$0xff] }
  0x3f   :  { %312 = vmatprep.subr.mxu0 %v243_v4  ;;  %v561_v4 = vld [vmem:[%s1524_s12 + $0x50] sm:$0xff] }
  0x40   :  { %313 = vmatpush1.msra.mxu0 %v242_v5  ;;  %v560_v5 = vld [vmem:[%s1524_s12 + $0x48] sm:$0xff] }
  0x41   :  { %314 = vmatprep.subr.mxu0 %v241_v6  ;;  %v559_v6 = vld [vmem:[%s1524_s12 + $0x40] sm:$0xff] }
  0x42   :  { %315 = vmatpush1.msra.mxu0 %v240_v7  ;;  %v558_v7 = vld [vmem:[%s1524_s12 + $0x38] sm:$0xff] }
  0x43   :  { %865 = vmatprep.subr.mxu0 %v966_v1 }
  0xe1   :  { %v141_v62 = vpop.f32.mrf.mxu0 }
  0xe2   :  { %v142_v63 = vadd.f32 %v669_v61, %v141_v62  ;;  %v457_v61 = vld [vmem:[%s1522_s10] sm:$0xff]  ;;  %v566_v62 = vld [vmem:[%s1524_s12 + $0x78] sm:$0xff] }
  0xe3   :  { %v794_v0 = vpop.f32.mrf.mxu0 }
  0xe4   :  { %v145_v2 = vmax.f32 %v142_v63, 0.0  ;;  %v565_v63 = vld [vmem:[%s1524_s12 + $0x70] sm:$0xff]  ;;  %v564_v0 = vld [vmem:[%s1524_s12 + $0x68] sm:$0xff] }
  0xe6   :  { %828 = vmatmul.mubr.f32.vlgmr.msra.gmra.mxu1 %v145_v2  ;;  %v563_v2 = vld [vmem:[%s1524_s12 + $0x60] sm:$0xff] }
  0xe7   :  { %862 = vmatprep.mubr.msk.f32.mxu1 %vm967_vm0, %v966_v1  ;;  %831 = vmatpush3.msra.mxu1 %v378_v8  ;;  %v557_v8 = vld [vmem:[%s1524_s12 + $0x30] sm:$0xff] }
  0xe8   :  { %832 = vmatprep.subr.mxu1 %v966_v1 }
  0xe9   :  { %833 = vmatpush3.msra.mxu1 %v377_v9  ;;  %v556_v9 = vld [vmem:[%s1524_s12 + $0x28] sm:$0xff] }
  0xea   :  { %834 = vmatprep.subr.mxu1 %v966_v1 }
  0xeb   :  { %835 = vmatpush3.msra.mxu1 %v376_v15 }
  0xec   :  { %836 = vmatprep.subr.mxu1 %v966_v1 }
  0xed   :  { %837 = vmatpush3.msra.mxu1 %v375_v16 }
  0xee   :  { %838 = vmatprep.subr.mxu1 %v966_v1 }
  0xef   :  { %839 = vmatpush3.msra.mxu1 %v374_v17  ;;  %v553_v17 = vld [vmem:[%s1524_s12 + $0x10] sm:$0xff] }
  0xf0   :  { %840 = vmatprep.subr.mxu1 %v966_v1 }
  0xf1   :  { %841 = vmatpush3.msra.mxu1 %v373_v18  ;;  %v552_v18 = vld [vmem:[%s1524_s12 + $0x8] sm:$0xff] }
  0xf2   :  { %842 = vmatprep.subr.mxu1 %v966_v1 }
  0xf3   :  { %843 = vmatpush3.msra.mxu1 %v372_v19  ;;  %v551_v19 = vld [vmem:[%s1524_s12] sm:$0xff] }
  0xf4   :  { %844 = vmatprep.subr.mxu1 %v966_v1 }
  0xf5   :  { %845 = vmatpush3.msra.mxu1 %v371_v20  ;;  %v672_v20 = vld [vmem:[%s1523_s11] ss:$0 sm:$0xff] }
  0xf6   :  { %846 = vmatprep.subr.mxu1 %v966_v1 }
  0xf7   :  { %847 = vmatpush3.msra.mxu1 %v370_v21 }
  0xf8   :  { %848 = vmatprep.subr.mxu1 %v966_v1 }
  0xf9   :  { %849 = vmatpush3.msra.mxu1 %v369_v22 }
  0xfa   :  { %850 = vmatprep.subr.mxu1 %v966_v1 }
  0xfb   :  { %851 = vmatpush3.msra.mxu1 %v368_v23 }
  0xfc   :  { %852 = vmatprep.subr.mxu1 %v966_v1 }
  0xfd   :  { %853 = vmatpush3.msra.mxu1 %v367_v24 }
  0xfe   :  { %854 = vmatprep.subr.mxu1 %v966_v1 }
  0xff   :  { %855 = vmatpush3.msra.mxu1 %v366_v25  ;;  %v673_v25 = vld [vmem:[%s1525_s13] ss:$0 sm:$0xff] }
 0x100   :  { %856 = vmatprep.subr.mxu1 %v966_v1 }
 0x101   :  { %857 = vmatpush3.msra.mxu1 %v365_v26 }
 0x102   :  { %858 = vmatprep.subr.mxu1 %v966_v1 }
 0x103   :  { %859 = vmatpush3.msra.mxu1 %v364_v27 }
 0x104   :  { %860 = vmatprep.subr.mxu1 %v966_v1 }
 0x105   :  { %861 = vmatpush3.msra.mxu1 %v363_v28 }
 0x106   :  { %900 = vmatprep.subr.mxu1 %v966_v1 }
 0x1a6   :  { %v235_v11 = vpop.f32.mrf.mxu1 }
 0x1a7   :  { %v236_v12 = vadd.f32 %v670_v10, %v235_v11  ;;  %v555_v10 = vld [vmem:[%s1524_s12 + $0x20] sm:$0xff]  ;;  %v554_v11 = vld [vmem:[%s1524_s12 + $0x18] sm:$0xff]  ;;  %s968_s12 = smov [#allocation2]  }
 0x1a8   :  { %v829_v13 = vpop.f32.mrf.mxu1  ;;  %s657_s4 = sshll.u32 %s968_s12, 4  ;;  %s658_s4 = int_to_ptr.vmem [resolvable:$true] %s657_s4 }
 0x1a9   :  { %v239_v14 = vmax.f32 %v236_v12, 0.0  ;;  %v671_v12 = vld [vmem:[%s1521_s9] ss:$0 sm:$0xff]  ;;  %s944_s11 = scalar_lea.vmem %s658_s4, 128  ;;  %p949_p1 = scmp.lt.s32.totalorder %s658_s4, %s658_s4 }
 0x1aa   :  { %p945_p0 = scmp.ne.s32.totalorder %s658_s4, %s944_s11  ;;  %p950_p2 = scmp.lt.s32.totalorder %s944_s11, %s944_s11 }
 0x1ab   :  { %349 = vmatmul.mubr.f32.vlgmr.msra.gmra.mxu0 %v239_v14 }
 0x1ac   :  { %897 = vmatprep.mubr.msk.f32.mxu0 %vm967_vm0, %v966_v1  ;;  %866 = vmatpush3.msra.mxu0 %v472_v29  ;;  %p951_p3 = por %p950_p2, %p949_p1 }
 0x1ad   :  { %867 = vmatprep.subr.mxu0 %v966_v1 }
 0x1ae   :  { %868 = vmatpush3.msra.mxu0 %v471_v30  ;;  %p952_p4 = pnand %p951_p3, %p945_p0 }
 0x1af   :  { %869 = vmatprep.subr.mxu0 %v966_v1 }
 0x1b0   :  { %870 = vmatpush3.msra.mxu0 %v470_v31 }
 0x1b1   :  { %871 = vmatprep.subr.mxu0 %v966_v1 }
 0x1b2   :  { %872 = vmatpush3.msra.mxu0 %v469_v32 }
 0x1b3   :  { %873 = vmatprep.subr.mxu0 %v966_v1 }
 0x1b4   :  { %874 = vmatpush3.msra.mxu0 %v468_v33 }
 0x1b5   :  { %875 = vmatprep.subr.mxu0 %v966_v1 }
 0x1b6   :  { %876 = vmatpush3.msra.mxu0 %v467_v34 }
 0x1b7   :  { %877 = vmatprep.subr.mxu0 %v966_v1 }
 0x1b8   :  { %878 = vmatpush3.msra.mxu0 %v466_v35 }
 0x1b9   :  { %879 = vmatprep.subr.mxu0 %v966_v1 }
 0x1ba   :  { %880 = vmatpush3.msra.mxu0 %v465_v36 }
 0x1bb   :  { %881 = vmatprep.subr.mxu0 %v966_v1 }
 0x1bc   :  { %882 = vmatpush3.msra.mxu0 %v464_v37 }
 0x1bd   :  { %883 = vmatprep.subr.mxu0 %v966_v1 }
 0x1be   :  { %884 = vmatpush3.msra.mxu0 %v463_v38 }
 0x1bf   :  { %885 = vmatprep.subr.mxu0 %v966_v1 }
 0x1c0   :  { %886 = vmatpush3.msra.mxu0 %v462_v39 }
 0x1c1   :  { %887 = vmatprep.subr.mxu0 %v966_v1 }
 0x1c2   :  { %888 = vmatpush3.msra.mxu0 %v461_v40 }
 0x1c3   :  { %889 = vmatprep.subr.mxu0 %v966_v1 }
 0x1c4   :  { %890 = vmatpush3.msra.mxu0 %v460_v41 }
 0x1c5   :  { %891 = vmatprep.subr.mxu0 %v966_v1 }
 0x1c6   :  { %892 = vmatpush3.msra.mxu0 %v459_v59 }
 0x1c7   :  { %893 = vmatprep.subr.mxu0 %v966_v1 }
 0x1c8   :  { %894 = vmatpush3.msra.mxu0 %v458_v60 }
 0x1c9   :  { %895 = vmatprep.subr.mxu0 %v966_v1 }
 0x1ca   :  { %896 = vmatpush3.msra.mxu0 %v457_v61 }
 0x26b   :  { %v350_v49 = vpop.f32.mrf.mxu0 }
 0x26c   :  { %v351_v50 = vadd.f32 %v350_v49, %v277_v47 }
 0x26d   :  { %v352_v51 = vpop.f32.mrf.mxu0 }
 0x26e   :  { %360 = vst [vmem:[%s1527_s15] sm:$0xff] %v351_v50  ;;  %v353_v52 = vadd.f32 %v352_v51, %v281_v48 }
 0x270   :  { %v355_v53 = vmul.f32 0.5, %v353_v52  ;;  %361 = vst [vmem:[%s1527_s15 + $0x8] sm:$0xff] %v353_v52 }
 0x272   :  { %v356_v54 = vmul.f32 1.442695, %v355_v53 }
 0x274   :  { %938 = vpow2.f32 %v356_v54 }
 0x281   :  { %v939_v56 = vpop.eup %938 }
 0x282   :  { %v358_v57 = vmul.f32 %v939_v56, %v51_v55 }
 0x284   :  { %v359_v58 = vadd.f32 %v358_v57, %v351_v50 }
 0x286   :  { %362 = vst [vmem:[%s1527_s15 + $0x10] sm:$0xff] %v359_v58  ;;  %863 = vmatmul.mubr.f32.vlgmr.msra.gmra.mxu1 %v359_v58 }
 0x287   :  { %932 = vmatprep.mubr.msk.f32.mxu1 %vm967_vm0, %v966_v1  ;;  %901 = vmatpush3.msra.mxu1 %v566_v62 }
 0x288   :  { %902 = vmatprep.subr.mxu1 %v966_v1 }
 0x289   :  { %903 = vmatpush3.msra.mxu1 %v565_v63 }
 0x28a   :  { %904 = vmatprep.subr.mxu1 %v966_v1 }
 0x28b   :  { %905 = vmatpush3.msra.mxu1 %v564_v0 }
 0x28c   :  { %906 = vmatprep.subr.mxu1 %v966_v1 }
 0x28d   :  { %907 = vmatpush3.msra.mxu1 %v563_v2 }
 0x28e   :  { %908 = vmatprep.subr.mxu1 %v966_v1 }
 0x28f   :  { %909 = vmatpush3.msra.mxu1 %v562_v3 }
 0x290   :  { %910 = vmatprep.subr.mxu1 %v966_v1 }
 0x291   :  { %911 = vmatpush3.msra.mxu1 %v561_v4 }
 0x292   :  { %912 = vmatprep.subr.mxu1 %v966_v1 }
 0x293   :  { %913 = vmatpush3.msra.mxu1 %v560_v5 }
 0x294   :  { %914 = vmatprep.subr.mxu1 %v966_v1 }
 0x295   :  { %915 = vmatpush3.msra.mxu1 %v559_v6 }
 0x296   :  { %916 = vmatprep.subr.mxu1 %v966_v1 }
 0x297   :  { %917 = vmatpush3.msra.mxu1 %v558_v7 }
 0x298   :  { %918 = vmatprep.subr.mxu1 %v966_v1 }
 0x299   :  { %919 = vmatpush3.msra.mxu1 %v557_v8 }
 0x29a   :  { %920 = vmatprep.subr.mxu1 %v966_v1 }
 0x29b   :  { %921 = vmatpush3.msra.mxu1 %v556_v9 }
 0x29c   :  { %922 = vmatprep.subr.mxu1 %v966_v1 }
 0x29d   :  { %923 = vmatpush3.msra.mxu1 %v555_v10 }
 0x29e   :  { %924 = vmatprep.subr.mxu1 %v966_v1 }
 0x29f   :  { %925 = vmatpush3.msra.mxu1 %v554_v11 }
 0x2a0   :  { %926 = vmatprep.subr.mxu1 %v966_v1 }
 0x2a1   :  { %927 = vmatpush3.msra.mxu1 %v553_v17 }
 0x2a2   :  { %928 = vmatprep.subr.mxu1 %v966_v1 }
 0x2a3   :  { %929 = vmatpush3.msra.mxu1 %v552_v18 }
 0x2a4   :  { %930 = vmatprep.subr.mxu1 %v966_v1 }
 0x2a5   :  { %931 = vmatpush3.msra.mxu1 %v551_v19 }
 0x346   :  { %v452_v13 = vpop.f32.mrf.mxu1 }
 0x347   :  { %v453_v14 = vadd.f32 %v671_v12, %v452_v13 }
 0x348   :  { %v864_v15 = vpop.f32.mrf.mxu1 }
 0x349   :  { %v456_v16 = vmax.f32 %v453_v14, 0.0 }
 0x34b   :  { %898 = vmatmul.mubr.f32.vlgmr.msra.gmra.mxu0 %v456_v16 }
 0x40b   :  { %v546_v21 = vpop.f32.mrf.mxu0 }
 0x40c   :  { %v547_v22 = vadd.f32 %v672_v20, %v546_v21 }
 0x40d   :  { %v899_v23 = vpop.f32.mrf.mxu0 }
 0x40e   :  { %v550_v24 = vmax.f32 %v547_v22, 0.0 }
 0x410   :  { %933 = vmatmul.mubr.f32.vlgmr.msra.gmra.mxu1 %v550_v24 }
 0x4d0   :  { %v640_v26 = vpop.f32.mrf.mxu1 }
 0x4d1   :  { %v641_v1 = vadd.f32 %v673_v25, %v640_v26 }
 0x4d2   :  { %v934_v27 = vpop.f32.mrf.mxu1 }
 0x4d3   :  { %v674_v28 = vmul.f32 -1.442695, %v641_v1 }
 0x4d5   :  { %940 = vpow2.f32 %v674_v28 }
 0x4e2   :  { %v941_v29 = vpop.eup %940 }
 0x4e3   :  { %v647_v30 = vadd.f32 1.0, %v941_v29 }
 0x4e5   :  { %942 = vrcp.f32 %v647_v30 }
 0x4f2   :  { %v943_v31 = vpop.eup %942 }
 0x4f3   :  { %650 = vst [vmem:[#allocation2] sm:$0xff] %v943_v31 }
 0x4f4   :  { %955 = shalt.err (!%p952_p4)
}
 0x4f5   :  { %660 = dma.vmem_to_hbm [thread:$0]  %s658_s4, 128, %s1526_s14, [#allocation3]  }
 0x4f6   :  { %964 = dma.done.wait [#allocation3], 128  }
 0x4f7   :  { %965 = vsyncadd [#allocation3], 4294967168 }
 0x4f8   :  { %668 = vsyncpa [#allocation3], 1 }

</bundles_post_ra>
